<compile_context>
chip_gen: v5e
topology: v5e:2x2
jax: 0.10.0
libtpu: 0.0.40
codegen_flags: <defaults>
</compile_context>

<pallas_src>
import functools

import jax
import jax.numpy as jnp
from jax.experimental import pallas as pl
from jax.experimental.pallas import tpu as pltpu


# ------------------------------ fused kernel ---------------------------------

def temporal_cnn_kernel(
    # inputs
    x_ref,                        # (T, B, Cin)   time-major input (f32)
    w1_ref, s1_ref, t1_ref,       # (3, Cin, C1), (1, C1), (1, C1)  conv1 + folded BN1
    w2_ref, s2_ref, t2_ref,       # (3, C1, H),   (1, H),  (1, H)   conv2 + folded BN2
    wih0_ref, whh0_ref, b0_ref,   # (H, 4H), (H, 4H), (1, 4H)       LSTM layer 0 (i,f,o,g cols)
    w1cat_ref, b1_ref,            # (2H, 4H), (1, 4H)               LSTM layer 1 fused [Wih;Whh]
    fcw_ref, fcb_ref,             # (H, 1), (1, 1)                  FC head
    # outputs
    o_ref,                        # (B, 1)
    # scratch (all VMEM)
    xp1_scr, xp2_scr, gx_scr,
    *, mxu_dtype, unroll):
  f32 = jnp.float32
  T, B, _ = x_ref.shape
  H = whh0_ref.shape[0]

  # -------- Conv1d(k=3, pad=1) + folded BN + ReLU: 3 accumulated matmuls -----
  def conv_bn_relu(x, w_ref, scale_ref, shift_ref, xp_scr):
    C = xp_scr.shape[-1]
    # zero ONLY the two halo rows; rows 1..T are fully overwritten just below
    xp_scr[0] = jnp.zeros((B, C), mxu_dtype)
    xp_scr[T + 1] = jnp.zeros((B, C), mxu_dtype)
    xp_scr[1:T + 1] = x.astype(mxu_dtype)
    # tap-indexed weights: leading-dim slices only, no lane-offset scatter
    y = (jnp.einsum('tbc,cd->tbd', xp_scr[0:T],
                    w_ref[0].astype(mxu_dtype), preferred_element_type=f32)
         + jnp.einsum('tbc,cd->tbd', xp_scr[1:T + 1],
                      w_ref[1].astype(mxu_dtype), preferred_element_type=f32)
         + jnp.einsum('tbc,cd->tbd', xp_scr[2:T + 2],
                      w_ref[2].astype(mxu_dtype), preferred_element_type=f32))
    y = y * scale_ref[...][None] + shift_ref[...][None]
    return jnp.maximum(y, 0.0)

  h = conv_bn_relu(x_ref[...], w1_ref, s1_ref, t1_ref, xp1_scr)
  h = conv_bn_relu(h, w2_ref, s2_ref, t2_ref, xp2_scr)          # (T, B, H) f32

  # -------- 2-layer LSTM, whole T loop in-kernel -----------------------------
  # Hoisted layer-0 input projection: ALL timesteps in one matmul (kept in f32
  # so the per-step gate accumulation stays full precision).
  gx_scr[...] = (jnp.einsum('tbh,hg->tbg', h.astype(mxu_dtype),
                            wih0_ref[...].astype(mxu_dtype),
                            preferred_element_type=f32)
                 + b0_ref[...][None])

  whh0 = whh0_ref[...].astype(mxu_dtype)
  w1cat = w1cat_ref[...].astype(mxu_dtype)
  b1 = b1_ref[...]

  def cell(gates, c_prev):
    # gate columns are ordered (i, f, o, g): one contiguous sigmoid + one tanh
    sig = jax.nn.sigmoid(gates[:, :3 * H])
    g = jnp.tanh(gates[:, 3 * H:])
    i = sig[:, 0 * H:1 * H]
    f = sig[:, 1 * H:2 * H]
    o = sig[:, 2 * H:3 * H]
    c = f * c_prev + i * g
    return o * jnp.tanh(c), c

  def step(t, carry):
    h0, c0, h1, c1 = carry
    # layer 0: only the recurrent projection stays on the serial path
    g0 = gx_scr[t] + jnp.dot(h0.astype(mxu_dtype), whh0,
                             preferred_element_type=f32)
    h0, c0 = cell(g0, c0)
    # TODO(synk): nn.LSTM inter-layer dropout (p=0.5) is a no-op in eval mode;
    # train-mode dropout is not implemented.
    # layer 1: single fused matmul [h0 | h1] @ [Wih1; Whh1]
    hh = jnp.concatenate([h0, h1], axis=-1)
    g1 = jnp.dot(hh.astype(mxu_dtype), w1cat, preferred_element_type=f32) + b1
    h1, c1 = cell(g1, c1)
    return (h0, c0, h1, c1)

  z = jnp.zeros((B, H), f32)
  _, _, h1, _ = jax.lax.fori_loop(0, T, step, (z, z, z, z), unroll=unroll)

  # -------- FC head ----------------------------------------------------------
  o_ref[...] = (jnp.dot(h1.astype(mxu_dtype), fcw_ref[...].astype(mxu_dtype),
                        preferred_element_type=f32) + fcb_ref[...])


# --------------------------------- wrapper ------------------------------------

def temporal_cnn_forward(x, params, *, mxu_dtype=jnp.bfloat16):
  # x: (B, T, input_dim) batch-first (or (B, input_dim), like the torch module).
  # mxu_dtype=jnp.bfloat16 is the performance default (f32 accumulate); pass
  # jnp.float32 for exact parity with the PyTorch reference numerics.
  if x.ndim == 2:
    x = x[:, None, :]                                    # torch: unsqueeze(1)
  x = x.astype(jnp.float32)
  B, T, Cin = x.shape

  # Pad batch to a sublane multiple (>=8): padded rows are independent garbage,
  # sliced off below; eliminates 2/8-sublane masked loads/stores everywhere.
  Bp = max(8, ((B + 7) // 8) * 8)
  if Bp != B:
    x = jnp.pad(x, ((0, Bp - B), (0, 0), (0, 0)))
  x_tm = jnp.transpose(x, (1, 0, 2))                     # (T, Bp, Cin) time-major

  C1 = params['bn1_scale'].shape[-1]
  H = params['lstm_whh0'].shape[0]
  unroll = True if T <= 8 else 8                         # bounded unroll at large T

  kernel = functools.partial(temporal_cnn_kernel, mxu_dtype=mxu_dtype,
                             unroll=unroll)
  out = pl.pallas_call(
      kernel,
      out_shape=jax.ShapeDtypeStruct((Bp, 1), jnp.float32),
      scratch_shapes=[
          pltpu.VMEM((T + 2, Bp, Cin), mxu_dtype),   # padded conv1 input
          pltpu.VMEM((T + 2, Bp, C1), mxu_dtype),    # padded conv2 input
          pltpu.VMEM((T, Bp, 4 * H), jnp.float32),   # hoisted X @ W_ih + b (layer 0)
      ],
      compiler_params=pltpu.CompilerParams(vmem_limit_bytes=32 * 1024 * 1024),
  )(x_tm,
    params['conv1_w'], params['bn1_scale'], params['bn1_shift'],
    params['conv2_w'], params['bn2_scale'], params['bn2_shift'],
    params['lstm_wih0'], params['lstm_whh0'], params['lstm_b0'],
    params['lstm_w1cat'], params['lstm_b1'],
    params['fc_w'], params['fc_b'])
  return out[:B]


# ----------------------------- parameter construction --------------------------

def init_params(key, input_dim, hidden_dim):
  eps = 1e-5
  ks = iter(jax.random.split(key, 32))

  def nrm(shape, s=0.1):
    return jax.random.normal(next(ks), shape, jnp.float32) * s

  def fold_bn(gamma, beta, mean, var, conv_bias):
    scale = gamma / jnp.sqrt(var + eps)
    shift = beta + scale * (conv_bias - mean)
    return scale.reshape(1, -1), shift.reshape(1, -1)

  def permute_gate_cols(w):
    # torch gate order (i, f, g, o) -> kernel order (i, f, o, g) along last axis
    i, f, g, o = jnp.split(w, 4, axis=-1)
    return jnp.concatenate([i, f, o, g], axis=-1)

  p = {}
  C1, H = 64, hidden_dim

  # conv1: torch weight (64, Cin, 3) -> tap-indexed layout (3, Cin, 64)
  w1 = nrm((C1, input_dim, 3)); b1 = nrm((C1,))
  g1, be1, m1, v1 = (1.0 + nrm((C1,)), nrm((C1,)), nrm((C1,)),
                     1.0 + jnp.abs(nrm((C1,))))
  p['conv1_w'] = jnp.transpose(w1, (2, 1, 0))
  p['bn1_scale'], p['bn1_shift'] = fold_bn(g1, be1, m1, v1, b1)

  # conv2: torch weight (H, 64, 3) -> tap-indexed layout (3, 64, H)
  w2 = nrm((H, C1, 3)); b2 = nrm((H,))
  g2, be2, m2, v2 = (1.0 + nrm((H,)), nrm((H,)), nrm((H,)),
                     1.0 + jnp.abs(nrm((H,))))
  p['conv2_w'] = jnp.transpose(w2, (2, 1, 0))
  p['bn2_scale'], p['bn2_shift'] = fold_bn(g2, be2, m2, v2, b2)

  # LSTM: torch weight_ih / weight_hh are (4H, in) with gate row order i,f,g,o.
  # Layer 0: separate W_ih (hoisted) and W_hh (recurrent).
  wih0 = nrm((4 * H, H)); whh0 = nrm((4 * H, H))
  bih0 = nrm((4 * H,));   bhh0 = nrm((4 * H,))
  p['lstm_wih0'] = permute_gate_cols(wih0.T)
  p['lstm_whh0'] = permute_gate_cols(whh0.T)
  p['lstm_b0'] = permute_gate_cols((bih0 + bhh0).reshape(1, 4 * H))

  # Layer 1: fuse [W_ih; W_hh] into one (2H, 4H) matrix.
  wih1 = nrm((4 * H, H)); whh1 = nrm((4 * H, H))
  bih1 = nrm((4 * H,));   bhh1 = nrm((4 * H,))
  p['lstm_w1cat'] = jnp.concatenate(
      [permute_gate_cols(wih1.T), permute_gate_cols(whh1.T)], axis=0)
  p['lstm_b1'] = permute_gate_cols((bih1 + bhh1).reshape(1, 4 * H))

  # fc: torch weight (1, H) -> (H, 1)
  wf = nrm((1, H)); bf = nrm((1,))
  p['fc_w'] = wf.T
  p['fc_b'] = bf.reshape(1, 1)
  return p


if __name__ == "__main__":
  B, T, INPUT_DIM, HIDDEN_DIM = 2, 8, 16, 32
  key = jax.random.PRNGKey(0)
  kx, kp = jax.random.split(key)
  x = jax.random.normal(kx, (B, T, INPUT_DIM), jnp.float32)
  params = init_params(kp, INPUT_DIM, HIDDEN_DIM)

  out = jax.jit(lambda xx: temporal_cnn_forward(xx, params))(x)
  out = jax.block_until_ready(out)
  assert out.shape == (B, 1) and out.dtype == jnp.float32
  print("KERNEL_OK")
</pallas_src>

<mosaic_0001>
module attributes {stable_mosaic.version = 11 : i64} {
  func.func @temporal_cnn_kernel(%arg0: memref<8x8x16xf32, #tpu.memory_space<vmem>>, %arg1: memref<3x16x64xf32, #tpu.memory_space<vmem>>, %arg2: memref<1x64xf32, #tpu.memory_space<vmem>>, %arg3: memref<1x64xf32, #tpu.memory_space<vmem>>, %arg4: memref<3x64x32xf32, #tpu.memory_space<vmem>>, %arg5: memref<1x32xf32, #tpu.memory_space<vmem>>, %arg6: memref<1x32xf32, #tpu.memory_space<vmem>>, %arg7: memref<32x128xf32, #tpu.memory_space<vmem>>, %arg8: memref<32x128xf32, #tpu.memory_space<vmem>>, %arg9: memref<1x128xf32, #tpu.memory_space<vmem>>, %arg10: memref<64x128xf32, #tpu.memory_space<vmem>>, %arg11: memref<1x128xf32, #tpu.memory_space<vmem>>, %arg12: memref<32x1xf32, #tpu.memory_space<vmem>>, %arg13: memref<1x1xf32, #tpu.memory_space<vmem>>, %arg14: memref<8x1xf32, #tpu.memory_space<vmem>>, %arg15: memref<10x8x16xbf16, #tpu.memory_space<vmem>>, %arg16: memref<10x8x64xbf16, #tpu.memory_space<vmem>>, %arg17: memref<8x8x128xf32, #tpu.memory_space<vmem>>) attributes {dimension_semantics = [], scalar_prefetch = 0 : i64, scratch_operands = 3 : i64, tpu.core_type = #tpu.core_type<tc>} {
    %c0 = arith.constant 0 : index
    %c0_0 = arith.constant 0 : index
    %c0_1 = arith.constant 0 : index
    %0 = vector.load %arg0[%c0, %c0_0, %c0_1] : memref<8x8x16xf32, #tpu.memory_space<vmem>>, vector<8x8x16xf32>
    %cst = arith.constant 0.000000e+00 : bf16
    %1 = vector.broadcast %cst : bf16 to vector<8x16xbf16>
    %c0_2 = arith.constant 0 : index
    %c0_3 = arith.constant 0 : index
    %c0_4 = arith.constant 0 : index
    %2 = vector.load %arg15[%c0_2, %c0_3, %c0_4] : memref<10x8x16xbf16, #tpu.memory_space<vmem>>, vector<1x8x16xbf16>
    %3 = vector.shape_cast %2 : vector<1x8x16xbf16> to vector<8x16xbf16>
    %4 = vector.shape_cast %1 : vector<8x16xbf16> to vector<1x8x16xbf16>
    tpu.vector_store %arg15[%c0_2, %c0_3, %c0_4], %4 {strides = array<i32>} : memref<10x8x16xbf16, #tpu.memory_space<vmem>>, vector<1x8x16xbf16>,
    %cst_5 = arith.constant 0.000000e+00 : bf16
    %5 = vector.broadcast %cst_5 : bf16 to vector<8x16xbf16>
    %c9 = arith.constant 9 : index
    %c0_6 = arith.constant 0 : index
    %c0_7 = arith.constant 0 : index
    %6 = vector.load %arg15[%c9, %c0_6, %c0_7] : memref<10x8x16xbf16, #tpu.memory_space<vmem>>, vector<1x8x16xbf16>
    %7 = vector.shape_cast %6 : vector<1x8x16xbf16> to vector<8x16xbf16>
    %8 = vector.shape_cast %5 : vector<8x16xbf16> to vector<1x8x16xbf16>
    tpu.vector_store %arg15[%c9, %c0_6, %c0_7], %8 {strides = array<i32>} : memref<10x8x16xbf16, #tpu.memory_space<vmem>>, vector<1x8x16xbf16>,
    %9 = arith.truncf %0 : vector<8x8x16xf32> to vector<8x8x16xbf16>
    %c1 = arith.constant 1 : index
    %c0_8 = arith.constant 0 : index
    %c0_9 = arith.constant 0 : index
    %10 = vector.load %arg15[%c1, %c0_8, %c0_9] : memref<10x8x16xbf16, #tpu.memory_space<vmem>>, vector<8x8x16xbf16>
    tpu.vector_store %arg15[%c1, %c0_8, %c0_9], %9 {strides = array<i32>} : memref<10x8x16xbf16, #tpu.memory_space<vmem>>, vector<8x8x16xbf16>,
    %c0_10 = arith.constant 0 : index
    %c0_11 = arith.constant 0 : index
    %c0_12 = arith.constant 0 : index
    %11 = vector.load %arg15[%c0_10, %c0_11, %c0_12] : memref<10x8x16xbf16, #tpu.memory_space<vmem>>, vector<8x8x16xbf16>
    %c0_13 = arith.constant 0 : index
    %c0_14 = arith.constant 0 : index
    %c0_15 = arith.constant 0 : index
    %12 = vector.load %arg1[%c0_13, %c0_14, %c0_15] : memref<3x16x64xf32, #tpu.memory_space<vmem>>, vector<1x16x64xf32>
    %13 = vector.shape_cast %12 : vector<1x16x64xf32> to vector<16x64xf32>
    %14 = arith.truncf %13 : vector<16x64xf32> to vector<16x64xbf16>
    "tpu.trace_start"() <{level = 10 : i32, message = "tbc,cd->tbd"}> : () -> ()
    %cst_16 = arith.constant dense<0.000000e+00> : vector<8x8x64xf32>
    %15 = tpu.matmul %11, %14, %cst_16 {dimension_numbers = #tpu.dot_dimension_numbers<[2], [0], [0, 1], [1], [0, 0, 0, 1, 1, 1], [], []>} : vector<8x8x16xbf16>, vector<16x64xbf16>, vector<8x8x64xf32> -> vector<8x8x64xf32>
    "tpu.trace_stop"() : () -> ()
    %c1_17 = arith.constant 1 : index
    %c0_18 = arith.constant 0 : index
    %c0_19 = arith.constant 0 : index
    %16 = vector.load %arg15[%c1_17, %c0_18, %c0_19] : memref<10x8x16xbf16, #tpu.memory_space<vmem>>, vector<8x8x16xbf16>
    %c1_20 = arith.constant 1 : index
    %c0_21 = arith.constant 0 : index
    %c0_22 = arith.constant 0 : index
    %17 = vector.load %arg1[%c1_20, %c0_21, %c0_22] : memref<3x16x64xf32, #tpu.memory_space<vmem>>, vector<1x16x64xf32>
    %18 = vector.shape_cast %17 : vector<1x16x64xf32> to vector<16x64xf32>
    %19 = arith.truncf %18 : vector<16x64xf32> to vector<16x64xbf16>
    "tpu.trace_start"() <{level = 10 : i32, message = "tbc,cd->tbd"}> : () -> ()
    %cst_23 = arith.constant dense<0.000000e+00> : vector<8x8x64xf32>
    %20 = tpu.matmul %16, %19, %cst_23 {dimension_numbers = #tpu.dot_dimension_numbers<[2], [0], [0, 1], [1], [0, 0, 0, 1, 1, 1], [], []>} : vector<8x8x16xbf16>, vector<16x64xbf16>, vector<8x8x64xf32> -> vector<8x8x64xf32>
    "tpu.trace_stop"() : () -> ()
    %21 = arith.addf %15, %20 : vector<8x8x64xf32>
    %c2 = arith.constant 2 : index
    %c0_24 = arith.constant 0 : index
    %c0_25 = arith.constant 0 : index
    %22 = vector.load %arg15[%c2, %c0_24, %c0_25] : memref<10x8x16xbf16, #tpu.memory_space<vmem>>, vector<8x8x16xbf16>
    %c2_26 = arith.constant 2 : index
    %c0_27 = arith.constant 0 : index
    %c0_28 = arith.constant 0 : index
    %23 = vector.load %arg1[%c2_26, %c0_27, %c0_28] : memref<3x16x64xf32, #tpu.memory_space<vmem>>, vector<1x16x64xf32>
    %24 = vector.shape_cast %23 : vector<1x16x64xf32> to vector<16x64xf32>
    %25 = arith.truncf %24 : vector<16x64xf32> to vector<16x64xbf16>
    "tpu.trace_start"() <{level = 10 : i32, message = "tbc,cd->tbd"}> : () -> ()
    %cst_29 = arith.constant dense<0.000000e+00> : vector<8x8x64xf32>
    %26 = tpu.matmul %22, %25, %cst_29 {dimension_numbers = #tpu.dot_dimension_numbers<[2], [0], [0, 1], [1], [0, 0, 0, 1, 1, 1], [], []>} : vector<8x8x16xbf16>, vector<16x64xbf16>, vector<8x8x64xf32> -> vector<8x8x64xf32>
    "tpu.trace_stop"() : () -> ()
    %27 = arith.addf %21, %26 : vector<8x8x64xf32>
    %c0_30 = arith.constant 0 : index
    %c0_31 = arith.constant 0 : index
    %28 = vector.load %arg2[%c0_30, %c0_31] : memref<1x64xf32, #tpu.memory_space<vmem>>, vector<1x64xf32>
    %29 = vector.shape_cast %28 : vector<1x64xf32> to vector<1x1x64xf32>
    %30 = vector.broadcast %29 : vector<1x1x64xf32> to vector<8x8x64xf32>
    %31 = arith.mulf %27, %30 : vector<8x8x64xf32>
    %c0_32 = arith.constant 0 : index
    %c0_33 = arith.constant 0 : index
    %32 = vector.load %arg3[%c0_32, %c0_33] : memref<1x64xf32, #tpu.memory_space<vmem>>, vector<1x64xf32>
    %33 = vector.shape_cast %32 : vector<1x64xf32> to vector<1x1x64xf32>
    %34 = vector.broadcast %33 : vector<1x1x64xf32> to vector<8x8x64xf32>
    %35 = arith.addf %31, %34 : vector<8x8x64xf32>
    %cst_34 = arith.constant 0.000000e+00 : f32
    %36 = vector.broadcast %cst_34 : f32 to vector<8x8x64xf32>
    %37 = arith.maximumf %35, %36 : vector<8x8x64xf32>
    %cst_35 = arith.constant 0.000000e+00 : bf16
    %38 = vector.broadcast %cst_35 : bf16 to vector<8x64xbf16>
    %c0_36 = arith.constant 0 : index
    %c0_37 = arith.constant 0 : index
    %c0_38 = arith.constant 0 : index
    %39 = vector.load %arg16[%c0_36, %c0_37, %c0_38] : memref<10x8x64xbf16, #tpu.memory_space<vmem>>, vector<1x8x64xbf16>
    %40 = vector.shape_cast %39 : vector<1x8x64xbf16> to vector<8x64xbf16>
    %41 = vector.shape_cast %38 : vector<8x64xbf16> to vector<1x8x64xbf16>
    tpu.vector_store %arg16[%c0_36, %c0_37, %c0_38], %41 {strides = array<i32>} : memref<10x8x64xbf16, #tpu.memory_space<vmem>>, vector<1x8x64xbf16>,
    %cst_39 = arith.constant 0.000000e+00 : bf16
    %42 = vector.broadcast %cst_39 : bf16 to vector<8x64xbf16>
    %c9_40 = arith.constant 9 : index
    %c0_41 = arith.constant 0 : index
    %c0_42 = arith.constant 0 : index
    %43 = vector.load %arg16[%c9_40, %c0_41, %c0_42] : memref<10x8x64xbf16, #tpu.memory_space<vmem>>, vector<1x8x64xbf16>
    %44 = vector.shape_cast %43 : vector<1x8x64xbf16> to vector<8x64xbf16>
    %45 = vector.shape_cast %42 : vector<8x64xbf16> to vector<1x8x64xbf16>
    tpu.vector_store %arg16[%c9_40, %c0_41, %c0_42], %45 {strides = array<i32>} : memref<10x8x64xbf16, #tpu.memory_space<vmem>>, vector<1x8x64xbf16>,
    %46 = arith.truncf %37 : vector<8x8x64xf32> to vector<8x8x64xbf16>
    %c1_43 = arith.constant 1 : index
    %c0_44 = arith.constant 0 : index
    %c0_45 = arith.constant 0 : index
    %47 = vector.load %arg16[%c1_43, %c0_44, %c0_45] : memref<10x8x64xbf16, #tpu.memory_space<vmem>>, vector<8x8x64xbf16>
    tpu.vector_store %arg16[%c1_43, %c0_44, %c0_45], %46 {strides = array<i32>} : memref<10x8x64xbf16, #tpu.memory_space<vmem>>, vector<8x8x64xbf16>,
    %c0_46 = arith.constant 0 : index
    %c0_47 = arith.constant 0 : index
    %c0_48 = arith.constant 0 : index
    %48 = vector.load %arg16[%c0_46, %c0_47, %c0_48] : memref<10x8x64xbf16, #tpu.memory_space<vmem>>, vector<8x8x64xbf16>
    %c0_49 = arith.constant 0 : index
    %c0_50 = arith.constant 0 : index
    %c0_51 = arith.constant 0 : index
    %49 = vector.load %arg4[%c0_49, %c0_50, %c0_51] : memref<3x64x32xf32, #tpu.memory_space<vmem>>, vector<1x64x32xf32>
    %50 = vector.shape_cast %49 : vector<1x64x32xf32> to vector<64x32xf32>
    %51 = arith.truncf %50 : vector<64x32xf32> to vector<64x32xbf16>
    "tpu.trace_start"() <{level = 10 : i32, message = "tbc,cd->tbd"}> : () -> ()
    %cst_52 = arith.constant dense<0.000000e+00> : vector<8x8x32xf32>
    %52 = tpu.matmul %48, %51, %cst_52 {dimension_numbers = #tpu.dot_dimension_numbers<[2], [0], [0, 1], [1], [0, 0, 0, 1, 1, 1], [], []>} : vector<8x8x64xbf16>, vector<64x32xbf16>, vector<8x8x32xf32> -> vector<8x8x32xf32>
    "tpu.trace_stop"() : () -> ()
    %c1_53 = arith.constant 1 : index
    %c0_54 = arith.constant 0 : index
    %c0_55 = arith.constant 0 : index
    %53 = vector.load %arg16[%c1_53, %c0_54, %c0_55] : memref<10x8x64xbf16, #tpu.memory_space<vmem>>, vector<8x8x64xbf16>
    %c1_56 = arith.constant 1 : index
    %c0_57 = arith.constant 0 : index
    %c0_58 = arith.constant 0 : index
    %54 = vector.load %arg4[%c1_56, %c0_57, %c0_58] : memref<3x64x32xf32, #tpu.memory_space<vmem>>, vector<1x64x32xf32>
    %55 = vector.shape_cast %54 : vector<1x64x32xf32> to vector<64x32xf32>
    %56 = arith.truncf %55 : vector<64x32xf32> to vector<64x32xbf16>
    "tpu.trace_start"() <{level = 10 : i32, message = "tbc,cd->tbd"}> : () -> ()
    %cst_59 = arith.constant dense<0.000000e+00> : vector<8x8x32xf32>
    %57 = tpu.matmul %53, %56, %cst_59 {dimension_numbers = #tpu.dot_dimension_numbers<[2], [0], [0, 1], [1], [0, 0, 0, 1, 1, 1], [], []>} : vector<8x8x64xbf16>, vector<64x32xbf16>, vector<8x8x32xf32> -> vector<8x8x32xf32>
    "tpu.trace_stop"() : () -> ()
    %58 = arith.addf %52, %57 : vector<8x8x32xf32>
    %c2_60 = arith.constant 2 : index
    %c0_61 = arith.constant 0 : index
    %c0_62 = arith.constant 0 : index
    %59 = vector.load %arg16[%c2_60, %c0_61, %c0_62] : memref<10x8x64xbf16, #tpu.memory_space<vmem>>, vector<8x8x64xbf16>
    %c2_63 = arith.constant 2 : index
    %c0_64 = arith.constant 0 : index
    %c0_65 = arith.constant 0 : index
    %60 = vector.load %arg4[%c2_63, %c0_64, %c0_65] : memref<3x64x32xf32, #tpu.memory_space<vmem>>, vector<1x64x32xf32>
    %61 = vector.shape_cast %60 : vector<1x64x32xf32> to vector<64x32xf32>
    %62 = arith.truncf %61 : vector<64x32xf32> to vector<64x32xbf16>
    "tpu.trace_start"() <{level = 10 : i32, message = "tbc,cd->tbd"}> : () -> ()
    %cst_66 = arith.constant dense<0.000000e+00> : vector<8x8x32xf32>
    %63 = tpu.matmul %59, %62, %cst_66 {dimension_numbers = #tpu.dot_dimension_numbers<[2], [0], [0, 1], [1], [0, 0, 0, 1, 1, 1], [], []>} : vector<8x8x64xbf16>, vector<64x32xbf16>, vector<8x8x32xf32> -> vector<8x8x32xf32>
    "tpu.trace_stop"() : () -> ()
    %64 = arith.addf %58, %63 : vector<8x8x32xf32>
    %c0_67 = arith.constant 0 : index
    %c0_68 = arith.constant 0 : index
    %65 = vector.load %arg5[%c0_67, %c0_68] : memref<1x32xf32, #tpu.memory_space<vmem>>, vector<1x32xf32>
    %66 = vector.shape_cast %65 : vector<1x32xf32> to vector<1x1x32xf32>
    %67 = vector.broadcast %66 : vector<1x1x32xf32> to vector<8x8x32xf32>
    %68 = arith.mulf %64, %67 : vector<8x8x32xf32>
    %c0_69 = arith.constant 0 : index
    %c0_70 = arith.constant 0 : index
    %69 = vector.load %arg6[%c0_69, %c0_70] : memref<1x32xf32, #tpu.memory_space<vmem>>, vector<1x32xf32>
    %70 = vector.shape_cast %69 : vector<1x32xf32> to vector<1x1x32xf32>
    %71 = vector.broadcast %70 : vector<1x1x32xf32> to vector<8x8x32xf32>
    %72 = arith.addf %68, %71 : vector<8x8x32xf32>
    %cst_71 = arith.constant 0.000000e+00 : f32
    %73 = vector.broadcast %cst_71 : f32 to vector<8x8x32xf32>
    %74 = arith.maximumf %72, %73 : vector<8x8x32xf32>
    %75 = arith.truncf %74 : vector<8x8x32xf32> to vector<8x8x32xbf16>
    %c0_72 = arith.constant 0 : index
    %c0_73 = arith.constant 0 : index
    %76 = vector.load %arg7[%c0_72, %c0_73] : memref<32x128xf32, #tpu.memory_space<vmem>>, vector<32x128xf32>
    %77 = arith.truncf %76 : vector<32x128xf32> to vector<32x128xbf16>
    "tpu.trace_start"() <{level = 10 : i32, message = "tbh,hg->tbg"}> : () -> ()
    %cst_74 = arith.constant dense<0.000000e+00> : vector<8x8x128xf32>
    %78 = tpu.matmul %75, %77, %cst_74 {dimension_numbers = #tpu.dot_dimension_numbers<[2], [0], [0, 1], [1], [0, 0, 0, 1, 1, 1], [], []>} : vector<8x8x32xbf16>, vector<32x128xbf16>, vector<8x8x128xf32> -> vector<8x8x128xf32>
    "tpu.trace_stop"() : () -> ()
    %c0_75 = arith.constant 0 : index
    %c0_76 = arith.constant 0 : index
    %79 = vector.load %arg9[%c0_75, %c0_76] : memref<1x128xf32, #tpu.memory_space<vmem>>, vector<1x128xf32>
    %80 = vector.shape_cast %79 : vector<1x128xf32> to vector<1x1x128xf32>
    %81 = vector.broadcast %80 : vector<1x1x128xf32> to vector<8x8x128xf32>
    %82 = arith.addf %78, %81 : vector<8x8x128xf32>
    %c0_77 = arith.constant 0 : index
    %c0_78 = arith.constant 0 : index
    %c0_79 = arith.constant 0 : index
    %83 = vector.load %arg17[%c0_77, %c0_78, %c0_79] : memref<8x8x128xf32, #tpu.memory_space<vmem>>, vector<8x8x128xf32>
    tpu.vector_store %arg17[%c0_77, %c0_78, %c0_79], %82 {strides = array<i32>} : memref<8x8x128xf32, #tpu.memory_space<vmem>>, vector<8x8x128xf32>,
    %c0_80 = arith.constant 0 : index
    %c0_81 = arith.constant 0 : index
    %84 = vector.load %arg8[%c0_80, %c0_81] : memref<32x128xf32, #tpu.memory_space<vmem>>, vector<32x128xf32>
    %85 = arith.truncf %84 : vector<32x128xf32> to vector<32x128xbf16>
    %c0_82 = arith.constant 0 : index
    %c0_83 = arith.constant 0 : index
    %86 = vector.load %arg10[%c0_82, %c0_83] : memref<64x128xf32, #tpu.memory_space<vmem>>, vector<64x128xf32>
    %87 = arith.truncf %86 : vector<64x128xf32> to vector<64x128xbf16>
    %c0_84 = arith.constant 0 : index
    %c0_85 = arith.constant 0 : index
    %88 = vector.load %arg11[%c0_84, %c0_85] : memref<1x128xf32, #tpu.memory_space<vmem>>, vector<1x128xf32>
    %cst_86 = arith.constant 0.000000e+00 : f32
    %89 = vector.broadcast %cst_86 : f32 to vector<8x32xf32>
    %c0_i32 = arith.constant 0 : i32
    %90 = arith.index_cast %c0_i32 : i32 to index
    %c0_87 = arith.constant 0 : index
    %c0_88 = arith.constant 0 : index
    %91 = vector.load %arg17[%90, %c0_87, %c0_88] : memref<8x8x128xf32, #tpu.memory_space<vmem>>, vector<1x8x128xf32>
    %92 = vector.shape_cast %91 : vector<1x8x128xf32> to vector<8x128xf32>
    %93 = arith.truncf %89 : vector<8x32xf32> to vector<8x32xbf16>
    %cst_89 = arith.constant dense<0.000000e+00> : vector<8x128xf32>
    %94 = tpu.matmul %93, %85, %cst_89 {dimension_numbers = #tpu.dot_dimension_numbers<[1], [0], [0], [1], [0, 0, 1, 1], [], []>} : vector<8x32xbf16>, vector<32x128xbf16>, vector<8x128xf32> -> vector<8x128xf32>
    %95 = arith.addf %92, %94 : vector<8x128xf32>
    %96 = vector.extract_strided_slice %95 {offsets = [0, 0], sizes = [8, 96], strides = [1, 1]} : vector<8x128xf32> to vector<8x96xf32>
    %97 = arith.negf %96 : vector<8x96xf32>
    %98 = math.exp %97 : vector<8x96xf32>
    %cst_90 = arith.constant 1.000000e+00 : f32
    %99 = vector.broadcast %cst_90 : f32 to vector<8x96xf32>
    %100 = arith.addf %99, %98 : vector<8x96xf32>
    %101 = arith.divf %99, %100 : vector<8x96xf32>
    %102 = vector.extract_strided_slice %95 {offsets = [0, 96], sizes = [8, 32], strides = [1, 1]} : vector<8x128xf32> to vector<8x32xf32>
    %103 = math.tanh %102 : vector<8x32xf32>
    %104 = vector.extract_strided_slice %101 {offsets = [0, 0], sizes = [8, 32], strides = [1, 1]} : vector<8x96xf32> to vector<8x32xf32>
    %105 = vector.extract_strided_slice %101 {offsets = [0, 32], sizes = [8, 32], strides = [1, 1]} : vector<8x96xf32> to vector<8x32xf32>
    %106 = vector.extract_strided_slice %101 {offsets = [0, 64], sizes = [8, 32], strides = [1, 1]} : vector<8x96xf32> to vector<8x32xf32>
    %107 = arith.mulf %105, %89 : vector<8x32xf32>
    %108 = arith.mulf %104, %103 : vector<8x32xf32>
    %109 = arith.addf %107, %108 : vector<8x32xf32>
    %110 = math.tanh %109 : vector<8x32xf32>
    %111 = arith.mulf %106, %110 : vector<8x32xf32>
    %112 = tpu.concatenate %111, %89 in 1 : vector<8x32xf32>, vector<8x32xf32> -> vector<8x64xf32>
    %113 = arith.truncf %112 : vector<8x64xf32> to vector<8x64xbf16>
    %cst_91 = arith.constant dense<0.000000e+00> : vector<8x128xf32>
    %114 = tpu.matmul %113, %87, %cst_91 {dimension_numbers = #tpu.dot_dimension_numbers<[1], [0], [0], [1], [0, 0, 1, 1], [], []>} : vector<8x64xbf16>, vector<64x128xbf16>, vector<8x128xf32> -> vector<8x128xf32>
    %115 = vector.broadcast %88 : vector<1x128xf32> to vector<8x128xf32>
    %116 = arith.addf %114, %115 : vector<8x128xf32>
    %117 = vector.extract_strided_slice %116 {offsets = [0, 0], sizes = [8, 96], strides = [1, 1]} : vector<8x128xf32> to vector<8x96xf32>
    %118 = arith.negf %117 : vector<8x96xf32>
    %119 = math.exp %118 : vector<8x96xf32>
    %cst_92 = arith.constant 1.000000e+00 : f32
    %120 = vector.broadcast %cst_92 : f32 to vector<8x96xf32>
    %121 = arith.addf %120, %119 : vector<8x96xf32>
    %122 = arith.divf %120, %121 : vector<8x96xf32>
    %123 = vector.extract_strided_slice %116 {offsets = [0, 96], sizes = [8, 32], strides = [1, 1]} : vector<8x128xf32> to vector<8x32xf32>
    %124 = math.tanh %123 : vector<8x32xf32>
    %125 = vector.extract_strided_slice %122 {offsets = [0, 0], sizes = [8, 32], strides = [1, 1]} : vector<8x96xf32> to vector<8x32xf32>
    %126 = vector.extract_strided_slice %122 {offsets = [0, 32], sizes = [8, 32], strides = [1, 1]} : vector<8x96xf32> to vector<8x32xf32>
    %127 = vector.extract_strided_slice %122 {offsets = [0, 64], sizes = [8, 32], strides = [1, 1]} : vector<8x96xf32> to vector<8x32xf32>
    %128 = arith.mulf %126, %89 : vector<8x32xf32>
    %129 = arith.mulf %125, %124 : vector<8x32xf32>
    %130 = arith.addf %128, %129 : vector<8x32xf32>
    %131 = math.tanh %130 : vector<8x32xf32>
    %132 = arith.mulf %127, %131 : vector<8x32xf32>
    %c1_i32 = arith.constant 1 : i32
    %133 = arith.index_cast %c1_i32 : i32 to index
    %c0_93 = arith.constant 0 : index
    %c0_94 = arith.constant 0 : index
    %134 = vector.load %arg17[%133, %c0_93, %c0_94] : memref<8x8x128xf32, #tpu.memory_space<vmem>>, vector<1x8x128xf32>
    %135 = vector.shape_cast %134 : vector<1x8x128xf32> to vector<8x128xf32>
    %136 = arith.truncf %111 : vector<8x32xf32> to vector<8x32xbf16>
    %cst_95 = arith.constant dense<0.000000e+00> : vector<8x128xf32>
    %137 = tpu.matmul %136, %85, %cst_95 {dimension_numbers = #tpu.dot_dimension_numbers<[1], [0], [0], [1], [0, 0, 1, 1], [], []>} : vector<8x32xbf16>, vector<32x128xbf16>, vector<8x128xf32> -> vector<8x128xf32>
    %138 = arith.addf %135, %137 : vector<8x128xf32>
    %139 = vector.extract_strided_slice %138 {offsets = [0, 0], sizes = [8, 96], strides = [1, 1]} : vector<8x128xf32> to vector<8x96xf32>
    %140 = arith.negf %139 : vector<8x96xf32>
    %141 = math.exp %140 : vector<8x96xf32>
    %cst_96 = arith.constant 1.000000e+00 : f32
    %142 = vector.broadcast %cst_96 : f32 to vector<8x96xf32>
    %143 = arith.addf %142, %141 : vector<8x96xf32>
    %144 = arith.divf %142, %143 : vector<8x96xf32>
    %145 = vector.extract_strided_slice %138 {offsets = [0, 96], sizes = [8, 32], strides = [1, 1]} : vector<8x128xf32> to vector<8x32xf32>
    %146 = math.tanh %145 : vector<8x32xf32>
    %147 = vector.extract_strided_slice %144 {offsets = [0, 0], sizes = [8, 32], strides = [1, 1]} : vector<8x96xf32> to vector<8x32xf32>
    %148 = vector.extract_strided_slice %144 {offsets = [0, 32], sizes = [8, 32], strides = [1, 1]} : vector<8x96xf32> to vector<8x32xf32>
    %149 = vector.extract_strided_slice %144 {offsets = [0, 64], sizes = [8, 32], strides = [1, 1]} : vector<8x96xf32> to vector<8x32xf32>
    %150 = arith.mulf %148, %109 : vector<8x32xf32>
    %151 = arith.mulf %147, %146 : vector<8x32xf32>
    %152 = arith.addf %150, %151 : vector<8x32xf32>
    %153 = math.tanh %152 : vector<8x32xf32>
    %154 = arith.mulf %149, %153 : vector<8x32xf32>
    %155 = tpu.concatenate %154, %132 in 1 : vector<8x32xf32>, vector<8x32xf32> -> vector<8x64xf32>
    %156 = arith.truncf %155 : vector<8x64xf32> to vector<8x64xbf16>
    %cst_97 = arith.constant dense<0.000000e+00> : vector<8x128xf32>
    %157 = tpu.matmul %156, %87, %cst_97 {dimension_numbers = #tpu.dot_dimension_numbers<[1], [0], [0], [1], [0, 0, 1, 1], [], []>} : vector<8x64xbf16>, vector<64x128xbf16>, vector<8x128xf32> -> vector<8x128xf32>
    %158 = vector.broadcast %88 : vector<1x128xf32> to vector<8x128xf32>
    %159 = arith.addf %157, %158 : vector<8x128xf32>
    %160 = vector.extract_strided_slice %159 {offsets = [0, 0], sizes = [8, 96], strides = [1, 1]} : vector<8x128xf32> to vector<8x96xf32>
    %161 = arith.negf %160 : vector<8x96xf32>
    %162 = math.exp %161 : vector<8x96xf32>
    %cst_98 = arith.constant 1.000000e+00 : f32
    %163 = vector.broadcast %cst_98 : f32 to vector<8x96xf32>
    %164 = arith.addf %163, %162 : vector<8x96xf32>
    %165 = arith.divf %163, %164 : vector<8x96xf32>
    %166 = vector.extract_strided_slice %159 {offsets = [0, 96], sizes = [8, 32], strides = [1, 1]} : vector<8x128xf32> to vector<8x32xf32>
    %167 = math.tanh %166 : vector<8x32xf32>
    %168 = vector.extract_strided_slice %165 {offsets = [0, 0], sizes = [8, 32], strides = [1, 1]} : vector<8x96xf32> to vector<8x32xf32>
    %169 = vector.extract_strided_slice %165 {offsets = [0, 32], sizes = [8, 32], strides = [1, 1]} : vector<8x96xf32> to vector<8x32xf32>
    %170 = vector.extract_strided_slice %165 {offsets = [0, 64], sizes = [8, 32], strides = [1, 1]} : vector<8x96xf32> to vector<8x32xf32>
    %171 = arith.mulf %169, %130 : vector<8x32xf32>
    %172 = arith.mulf %168, %167 : vector<8x32xf32>
    %173 = arith.addf %171, %172 : vector<8x32xf32>
    %174 = math.tanh %173 : vector<8x32xf32>
    %175 = arith.mulf %170, %174 : vector<8x32xf32>
    %c2_i32 = arith.constant 2 : i32
    %176 = arith.index_cast %c2_i32 : i32 to index
    %c0_99 = arith.constant 0 : index
    %c0_100 = arith.constant 0 : index
    %177 = vector.load %arg17[%176, %c0_99, %c0_100] : memref<8x8x128xf32, #tpu.memory_space<vmem>>, vector<1x8x128xf32>
    %178 = vector.shape_cast %177 : vector<1x8x128xf32> to vector<8x128xf32>
    %179 = arith.truncf %154 : vector<8x32xf32> to vector<8x32xbf16>
    %cst_101 = arith.constant dense<0.000000e+00> : vector<8x128xf32>
    %180 = tpu.matmul %179, %85, %cst_101 {dimension_numbers = #tpu.dot_dimension_numbers<[1], [0], [0], [1], [0, 0, 1, 1], [], []>} : vector<8x32xbf16>, vector<32x128xbf16>, vector<8x128xf32> -> vector<8x128xf32>
    %181 = arith.addf %178, %180 : vector<8x128xf32>
    %182 = vector.extract_strided_slice %181 {offsets = [0, 0], sizes = [8, 96], strides = [1, 1]} : vector<8x128xf32> to vector<8x96xf32>
    %183 = arith.negf %182 : vector<8x96xf32>
    %184 = math.exp %183 : vector<8x96xf32>
    %cst_102 = arith.constant 1.000000e+00 : f32
    %185 = vector.broadcast %cst_102 : f32 to vector<8x96xf32>
    %186 = arith.addf %185, %184 : vector<8x96xf32>
    %187 = arith.divf %185, %186 : vector<8x96xf32>
    %188 = vector.extract_strided_slice %181 {offsets = [0, 96], sizes = [8, 32], strides = [1, 1]} : vector<8x128xf32> to vector<8x32xf32>
    %189 = math.tanh %188 : vector<8x32xf32>
    %190 = vector.extract_strided_slice %187 {offsets = [0, 0], sizes = [8, 32], strides = [1, 1]} : vector<8x96xf32> to vector<8x32xf32>
    %191 = vector.extract_strided_slice %187 {offsets = [0, 32], sizes = [8, 32], strides = [1, 1]} : vector<8x96xf32> to vector<8x32xf32>
    %192 = vector.extract_strided_slice %187 {offsets = [0, 64], sizes = [8, 32], strides = [1, 1]} : vector<8x96xf32> to vector<8x32xf32>
    %193 = arith.mulf %191, %152 : vector<8x32xf32>
    %194 = arith.mulf %190, %189 : vector<8x32xf32>
    %195 = arith.addf %193, %194 : vector<8x32xf32>
    %196 = math.tanh %195 : vector<8x32xf32>
    %197 = arith.mulf %192, %196 : vector<8x32xf32>
    %198 = tpu.concatenate %197, %175 in 1 : vector<8x32xf32>, vector<8x32xf32> -> vector<8x64xf32>
    %199 = arith.truncf %198 : vector<8x64xf32> to vector<8x64xbf16>
    %cst_103 = arith.constant dense<0.000000e+00> : vector<8x128xf32>
    %200 = tpu.matmul %199, %87, %cst_103 {dimension_numbers = #tpu.dot_dimension_numbers<[1], [0], [0], [1], [0, 0, 1, 1], [], []>} : vector<8x64xbf16>, vector<64x128xbf16>, vector<8x128xf32> -> vector<8x128xf32>
    %201 = vector.broadcast %88 : vector<1x128xf32> to vector<8x128xf32>
    %202 = arith.addf %200, %201 : vector<8x128xf32>
    %203 = vector.extract_strided_slice %202 {offsets = [0, 0], sizes = [8, 96], strides = [1, 1]} : vector<8x128xf32> to vector<8x96xf32>
    %204 = arith.negf %203 : vector<8x96xf32>
    %205 = math.exp %204 : vector<8x96xf32>
    %cst_104 = arith.constant 1.000000e+00 : f32
    %206 = vector.broadcast %cst_104 : f32 to vector<8x96xf32>
    %207 = arith.addf %206, %205 : vector<8x96xf32>
    %208 = arith.divf %206, %207 : vector<8x96xf32>
    %209 = vector.extract_strided_slice %202 {offsets = [0, 96], sizes = [8, 32], strides = [1, 1]} : vector<8x128xf32> to vector<8x32xf32>
    %210 = math.tanh %209 : vector<8x32xf32>
    %211 = vector.extract_strided_slice %208 {offsets = [0, 0], sizes = [8, 32], strides = [1, 1]} : vector<8x96xf32> to vector<8x32xf32>
    %212 = vector.extract_strided_slice %208 {offsets = [0, 32], sizes = [8, 32], strides = [1, 1]} : vector<8x96xf32> to vector<8x32xf32>
    %213 = vector.extract_strided_slice %208 {offsets = [0, 64], sizes = [8, 32], strides = [1, 1]} : vector<8x96xf32> to vector<8x32xf32>
    %214 = arith.mulf %212, %173 : vector<8x32xf32>
    %215 = arith.mulf %211, %210 : vector<8x32xf32>
    %216 = arith.addf %214, %215 : vector<8x32xf32>
    %217 = math.tanh %216 : vector<8x32xf32>
    %218 = arith.mulf %213, %217 : vector<8x32xf32>
    %c3_i32 = arith.constant 3 : i32
    %219 = arith.index_cast %c3_i32 : i32 to index
    %c0_105 = arith.constant 0 : index
    %c0_106 = arith.constant 0 : index
    %220 = vector.load %arg17[%219, %c0_105, %c0_106] : memref<8x8x128xf32, #tpu.memory_space<vmem>>, vector<1x8x128xf32>
    %221 = vector.shape_cast %220 : vector<1x8x128xf32> to vector<8x128xf32>
    %222 = arith.truncf %197 : vector<8x32xf32> to vector<8x32xbf16>
    %cst_107 = arith.constant dense<0.000000e+00> : vector<8x128xf32>
    %223 = tpu.matmul %222, %85, %cst_107 {dimension_numbers = #tpu.dot_dimension_numbers<[1], [0], [0], [1], [0, 0, 1, 1], [], []>} : vector<8x32xbf16>, vector<32x128xbf16>, vector<8x128xf32> -> vector<8x128xf32>
    %224 = arith.addf %221, %223 : vector<8x128xf32>
    %225 = vector.extract_strided_slice %224 {offsets = [0, 0], sizes = [8, 96], strides = [1, 1]} : vector<8x128xf32> to vector<8x96xf32>
    %226 = arith.negf %225 : vector<8x96xf32>
    %227 = math.exp %226 : vector<8x96xf32>
    %cst_108 = arith.constant 1.000000e+00 : f32
    %228 = vector.broadcast %cst_108 : f32 to vector<8x96xf32>
    %229 = arith.addf %228, %227 : vector<8x96xf32>
    %230 = arith.divf %228, %229 : vector<8x96xf32>
    %231 = vector.extract_strided_slice %224 {offsets = [0, 96], sizes = [8, 32], strides = [1, 1]} : vector<8x128xf32> to vector<8x32xf32>
    %232 = math.tanh %231 : vector<8x32xf32>
    %233 = vector.extract_strided_slice %230 {offsets = [0, 0], sizes = [8, 32], strides = [1, 1]} : vector<8x96xf32> to vector<8x32xf32>
    %234 = vector.extract_strided_slice %230 {offsets = [0, 32], sizes = [8, 32], strides = [1, 1]} : vector<8x96xf32> to vector<8x32xf32>
    %235 = vector.extract_strided_slice %230 {offsets = [0, 64], sizes = [8, 32], strides = [1, 1]} : vector<8x96xf32> to vector<8x32xf32>
    %236 = arith.mulf %234, %195 : vector<8x32xf32>
    %237 = arith.mulf %233, %232 : vector<8x32xf32>
    %238 = arith.addf %236, %237 : vector<8x32xf32>
    %239 = math.tanh %238 : vector<8x32xf32>
    %240 = arith.mulf %235, %239 : vector<8x32xf32>
    %241 = tpu.concatenate %240, %218 in 1 : vector<8x32xf32>, vector<8x32xf32> -> vector<8x64xf32>
    %242 = arith.truncf %241 : vector<8x64xf32> to vector<8x64xbf16>
    %cst_109 = arith.constant dense<0.000000e+00> : vector<8x128xf32>
    %243 = tpu.matmul %242, %87, %cst_109 {dimension_numbers = #tpu.dot_dimension_numbers<[1], [0], [0], [1], [0, 0, 1, 1], [], []>} : vector<8x64xbf16>, vector<64x128xbf16>, vector<8x128xf32> -> vector<8x128xf32>
    %244 = vector.broadcast %88 : vector<1x128xf32> to vector<8x128xf32>
    %245 = arith.addf %243, %244 : vector<8x128xf32>
    %246 = vector.extract_strided_slice %245 {offsets = [0, 0], sizes = [8, 96], strides = [1, 1]} : vector<8x128xf32> to vector<8x96xf32>
    %247 = arith.negf %246 : vector<8x96xf32>
    %248 = math.exp %247 : vector<8x96xf32>
    %cst_110 = arith.constant 1.000000e+00 : f32
    %249 = vector.broadcast %cst_110 : f32 to vector<8x96xf32>
    %250 = arith.addf %249, %248 : vector<8x96xf32>
    %251 = arith.divf %249, %250 : vector<8x96xf32>
    %252 = vector.extract_strided_slice %245 {offsets = [0, 96], sizes = [8, 32], strides = [1, 1]} : vector<8x128xf32> to vector<8x32xf32>
    %253 = math.tanh %252 : vector<8x32xf32>
    %254 = vector.extract_strided_slice %251 {offsets = [0, 0], sizes = [8, 32], strides = [1, 1]} : vector<8x96xf32> to vector<8x32xf32>
    %255 = vector.extract_strided_slice %251 {offsets = [0, 32], sizes = [8, 32], strides = [1, 1]} : vector<8x96xf32> to vector<8x32xf32>
    %256 = vector.extract_strided_slice %251 {offsets = [0, 64], sizes = [8, 32], strides = [1, 1]} : vector<8x96xf32> to vector<8x32xf32>
    %257 = arith.mulf %255, %216 : vector<8x32xf32>
    %258 = arith.mulf %254, %253 : vector<8x32xf32>
    %259 = arith.addf %257, %258 : vector<8x32xf32>
    %260 = math.tanh %259 : vector<8x32xf32>
    %261 = arith.mulf %256, %260 : vector<8x32xf32>
    %c4_i32 = arith.constant 4 : i32
    %262 = arith.index_cast %c4_i32 : i32 to index
    %c0_111 = arith.constant 0 : index
    %c0_112 = arith.constant 0 : index
    %263 = vector.load %arg17[%262, %c0_111, %c0_112] : memref<8x8x128xf32, #tpu.memory_space<vmem>>, vector<1x8x128xf32>
    %264 = vector.shape_cast %263 : vector<1x8x128xf32> to vector<8x128xf32>
    %265 = arith.truncf %240 : vector<8x32xf32> to vector<8x32xbf16>
    %cst_113 = arith.constant dense<0.000000e+00> : vector<8x128xf32>
    %266 = tpu.matmul %265, %85, %cst_113 {dimension_numbers = #tpu.dot_dimension_numbers<[1], [0], [0], [1], [0, 0, 1, 1], [], []>} : vector<8x32xbf16>, vector<32x128xbf16>, vector<8x128xf32> -> vector<8x128xf32>
    %267 = arith.addf %264, %266 : vector<8x128xf32>
    %268 = vector.extract_strided_slice %267 {offsets = [0, 0], sizes = [8, 96], strides = [1, 1]} : vector<8x128xf32> to vector<8x96xf32>
    %269 = arith.negf %268 : vector<8x96xf32>
    %270 = math.exp %269 : vector<8x96xf32>
    %cst_114 = arith.constant 1.000000e+00 : f32
    %271 = vector.broadcast %cst_114 : f32 to vector<8x96xf32>
    %272 = arith.addf %271, %270 : vector<8x96xf32>
    %273 = arith.divf %271, %272 : vector<8x96xf32>
    %274 = vector.extract_strided_slice %267 {offsets = [0, 96], sizes = [8, 32], strides = [1, 1]} : vector<8x128xf32> to vector<8x32xf32>
    %275 = math.tanh %274 : vector<8x32xf32>
    %276 = vector.extract_strided_slice %273 {offsets = [0, 0], sizes = [8, 32], strides = [1, 1]} : vector<8x96xf32> to vector<8x32xf32>
    %277 = vector.extract_strided_slice %273 {offsets = [0, 32], sizes = [8, 32], strides = [1, 1]} : vector<8x96xf32> to vector<8x32xf32>
    %278 = vector.extract_strided_slice %273 {offsets = [0, 64], sizes = [8, 32], strides = [1, 1]} : vector<8x96xf32> to vector<8x32xf32>
    %279 = arith.mulf %277, %238 : vector<8x32xf32>
    %280 = arith.mulf %276, %275 : vector<8x32xf32>
    %281 = arith.addf %279, %280 : vector<8x32xf32>
    %282 = math.tanh %281 : vector<8x32xf32>
    %283 = arith.mulf %278, %282 : vector<8x32xf32>
    %284 = tpu.concatenate %283, %261 in 1 : vector<8x32xf32>, vector<8x32xf32> -> vector<8x64xf32>
    %285 = arith.truncf %284 : vector<8x64xf32> to vector<8x64xbf16>
    %cst_115 = arith.constant dense<0.000000e+00> : vector<8x128xf32>
    %286 = tpu.matmul %285, %87, %cst_115 {dimension_numbers = #tpu.dot_dimension_numbers<[1], [0], [0], [1], [0, 0, 1, 1], [], []>} : vector<8x64xbf16>, vector<64x128xbf16>, vector<8x128xf32> -> vector<8x128xf32>
    %287 = vector.broadcast %88 : vector<1x128xf32> to vector<8x128xf32>
    %288 = arith.addf %286, %287 : vector<8x128xf32>
    %289 = vector.extract_strided_slice %288 {offsets = [0, 0], sizes = [8, 96], strides = [1, 1]} : vector<8x128xf32> to vector<8x96xf32>
    %290 = arith.negf %289 : vector<8x96xf32>
    %291 = math.exp %290 : vector<8x96xf32>
    %cst_116 = arith.constant 1.000000e+00 : f32
    %292 = vector.broadcast %cst_116 : f32 to vector<8x96xf32>
    %293 = arith.addf %292, %291 : vector<8x96xf32>
    %294 = arith.divf %292, %293 : vector<8x96xf32>
    %295 = vector.extract_strided_slice %288 {offsets = [0, 96], sizes = [8, 32], strides = [1, 1]} : vector<8x128xf32> to vector<8x32xf32>
    %296 = math.tanh %295 : vector<8x32xf32>
    %297 = vector.extract_strided_slice %294 {offsets = [0, 0], sizes = [8, 32], strides = [1, 1]} : vector<8x96xf32> to vector<8x32xf32>
    %298 = vector.extract_strided_slice %294 {offsets = [0, 32], sizes = [8, 32], strides = [1, 1]} : vector<8x96xf32> to vector<8x32xf32>
    %299 = vector.extract_strided_slice %294 {offsets = [0, 64], sizes = [8, 32], strides = [1, 1]} : vector<8x96xf32> to vector<8x32xf32>
    %300 = arith.mulf %298, %259 : vector<8x32xf32>
    %301 = arith.mulf %297, %296 : vector<8x32xf32>
    %302 = arith.addf %300, %301 : vector<8x32xf32>
    %303 = math.tanh %302 : vector<8x32xf32>
    %304 = arith.mulf %299, %303 : vector<8x32xf32>
    %c5_i32 = arith.constant 5 : i32
    %305 = arith.index_cast %c5_i32 : i32 to index
    %c0_117 = arith.constant 0 : index
    %c0_118 = arith.constant 0 : index
    %306 = vector.load %arg17[%305, %c0_117, %c0_118] : memref<8x8x128xf32, #tpu.memory_space<vmem>>, vector<1x8x128xf32>
    %307 = vector.shape_cast %306 : vector<1x8x128xf32> to vector<8x128xf32>
    %308 = arith.truncf %283 : vector<8x32xf32> to vector<8x32xbf16>
    %cst_119 = arith.constant dense<0.000000e+00> : vector<8x128xf32>
    %309 = tpu.matmul %308, %85, %cst_119 {dimension_numbers = #tpu.dot_dimension_numbers<[1], [0], [0], [1], [0, 0, 1, 1], [], []>} : vector<8x32xbf16>, vector<32x128xbf16>, vector<8x128xf32> -> vector<8x128xf32>
    %310 = arith.addf %307, %309 : vector<8x128xf32>
    %311 = vector.extract_strided_slice %310 {offsets = [0, 0], sizes = [8, 96], strides = [1, 1]} : vector<8x128xf32> to vector<8x96xf32>
    %312 = arith.negf %311 : vector<8x96xf32>
    %313 = math.exp %312 : vector<8x96xf32>
    %cst_120 = arith.constant 1.000000e+00 : f32
    %314 = vector.broadcast %cst_120 : f32 to vector<8x96xf32>
    %315 = arith.addf %314, %313 : vector<8x96xf32>
    %316 = arith.divf %314, %315 : vector<8x96xf32>
    %317 = vector.extract_strided_slice %310 {offsets = [0, 96], sizes = [8, 32], strides = [1, 1]} : vector<8x128xf32> to vector<8x32xf32>
    %318 = math.tanh %317 : vector<8x32xf32>
    %319 = vector.extract_strided_slice %316 {offsets = [0, 0], sizes = [8, 32], strides = [1, 1]} : vector<8x96xf32> to vector<8x32xf32>
    %320 = vector.extract_strided_slice %316 {offsets = [0, 32], sizes = [8, 32], strides = [1, 1]} : vector<8x96xf32> to vector<8x32xf32>
    %321 = vector.extract_strided_slice %316 {offsets = [0, 64], sizes = [8, 32], strides = [1, 1]} : vector<8x96xf32> to vector<8x32xf32>
    %322 = arith.mulf %320, %281 : vector<8x32xf32>
    %323 = arith.mulf %319, %318 : vector<8x32xf32>
    %324 = arith.addf %322, %323 : vector<8x32xf32>
    %325 = math.tanh %324 : vector<8x32xf32>
    %326 = arith.mulf %321, %325 : vector<8x32xf32>
    %327 = tpu.concatenate %326, %304 in 1 : vector<8x32xf32>, vector<8x32xf32> -> vector<8x64xf32>
    %328 = arith.truncf %327 : vector<8x64xf32> to vector<8x64xbf16>
    %cst_121 = arith.constant dense<0.000000e+00> : vector<8x128xf32>
    %329 = tpu.matmul %328, %87, %cst_121 {dimension_numbers = #tpu.dot_dimension_numbers<[1], [0], [0], [1], [0, 0, 1, 1], [], []>} : vector<8x64xbf16>, vector<64x128xbf16>, vector<8x128xf32> -> vector<8x128xf32>
    %330 = vector.broadcast %88 : vector<1x128xf32> to vector<8x128xf32>
    %331 = arith.addf %329, %330 : vector<8x128xf32>
    %332 = vector.extract_strided_slice %331 {offsets = [0, 0], sizes = [8, 96], strides = [1, 1]} : vector<8x128xf32> to vector<8x96xf32>
    %333 = arith.negf %332 : vector<8x96xf32>
    %334 = math.exp %333 : vector<8x96xf32>
    %cst_122 = arith.constant 1.000000e+00 : f32
    %335 = vector.broadcast %cst_122 : f32 to vector<8x96xf32>
    %336 = arith.addf %335, %334 : vector<8x96xf32>
    %337 = arith.divf %335, %336 : vector<8x96xf32>
    %338 = vector.extract_strided_slice %331 {offsets = [0, 96], sizes = [8, 32], strides = [1, 1]} : vector<8x128xf32> to vector<8x32xf32>
    %339 = math.tanh %338 : vector<8x32xf32>
    %340 = vector.extract_strided_slice %337 {offsets = [0, 0], sizes = [8, 32], strides = [1, 1]} : vector<8x96xf32> to vector<8x32xf32>
    %341 = vector.extract_strided_slice %337 {offsets = [0, 32], sizes = [8, 32], strides = [1, 1]} : vector<8x96xf32> to vector<8x32xf32>
    %342 = vector.extract_strided_slice %337 {offsets = [0, 64], sizes = [8, 32], strides = [1, 1]} : vector<8x96xf32> to vector<8x32xf32>
    %343 = arith.mulf %341, %302 : vector<8x32xf32>
    %344 = arith.mulf %340, %339 : vector<8x32xf32>
    %345 = arith.addf %343, %344 : vector<8x32xf32>
    %346 = math.tanh %345 : vector<8x32xf32>
    %347 = arith.mulf %342, %346 : vector<8x32xf32>
    %c6_i32 = arith.constant 6 : i32
    %348 = arith.index_cast %c6_i32 : i32 to index
    %c0_123 = arith.constant 0 : index
    %c0_124 = arith.constant 0 : index
    %349 = vector.load %arg17[%348, %c0_123, %c0_124] : memref<8x8x128xf32, #tpu.memory_space<vmem>>, vector<1x8x128xf32>
    %350 = vector.shape_cast %349 : vector<1x8x128xf32> to vector<8x128xf32>
    %351 = arith.truncf %326 : vector<8x32xf32> to vector<8x32xbf16>
    %cst_125 = arith.constant dense<0.000000e+00> : vector<8x128xf32>
    %352 = tpu.matmul %351, %85, %cst_125 {dimension_numbers = #tpu.dot_dimension_numbers<[1], [0], [0], [1], [0, 0, 1, 1], [], []>} : vector<8x32xbf16>, vector<32x128xbf16>, vector<8x128xf32> -> vector<8x128xf32>
    %353 = arith.addf %350, %352 : vector<8x128xf32>
    %354 = vector.extract_strided_slice %353 {offsets = [0, 0], sizes = [8, 96], strides = [1, 1]} : vector<8x128xf32> to vector<8x96xf32>
    %355 = arith.negf %354 : vector<8x96xf32>
    %356 = math.exp %355 : vector<8x96xf32>
    %cst_126 = arith.constant 1.000000e+00 : f32
    %357 = vector.broadcast %cst_126 : f32 to vector<8x96xf32>
    %358 = arith.addf %357, %356 : vector<8x96xf32>
    %359 = arith.divf %357, %358 : vector<8x96xf32>
    %360 = vector.extract_strided_slice %353 {offsets = [0, 96], sizes = [8, 32], strides = [1, 1]} : vector<8x128xf32> to vector<8x32xf32>
    %361 = math.tanh %360 : vector<8x32xf32>
    %362 = vector.extract_strided_slice %359 {offsets = [0, 0], sizes = [8, 32], strides = [1, 1]} : vector<8x96xf32> to vector<8x32xf32>
    %363 = vector.extract_strided_slice %359 {offsets = [0, 32], sizes = [8, 32], strides = [1, 1]} : vector<8x96xf32> to vector<8x32xf32>
    %364 = vector.extract_strided_slice %359 {offsets = [0, 64], sizes = [8, 32], strides = [1, 1]} : vector<8x96xf32> to vector<8x32xf32>
    %365 = arith.mulf %363, %324 : vector<8x32xf32>
    %366 = arith.mulf %362, %361 : vector<8x32xf32>
    %367 = arith.addf %365, %366 : vector<8x32xf32>
    %368 = math.tanh %367 : vector<8x32xf32>
    %369 = arith.mulf %364, %368 : vector<8x32xf32>
    %370 = tpu.concatenate %369, %347 in 1 : vector<8x32xf32>, vector<8x32xf32> -> vector<8x64xf32>
    %371 = arith.truncf %370 : vector<8x64xf32> to vector<8x64xbf16>
    %cst_127 = arith.constant dense<0.000000e+00> : vector<8x128xf32>
    %372 = tpu.matmul %371, %87, %cst_127 {dimension_numbers = #tpu.dot_dimension_numbers<[1], [0], [0], [1], [0, 0, 1, 1], [], []>} : vector<8x64xbf16>, vector<64x128xbf16>, vector<8x128xf32> -> vector<8x128xf32>
    %373 = vector.broadcast %88 : vector<1x128xf32> to vector<8x128xf32>
    %374 = arith.addf %372, %373 : vector<8x128xf32>
    %375 = vector.extract_strided_slice %374 {offsets = [0, 0], sizes = [8, 96], strides = [1, 1]} : vector<8x128xf32> to vector<8x96xf32>
    %376 = arith.negf %375 : vector<8x96xf32>
    %377 = math.exp %376 : vector<8x96xf32>
    %cst_128 = arith.constant 1.000000e+00 : f32
    %378 = vector.broadcast %cst_128 : f32 to vector<8x96xf32>
    %379 = arith.addf %378, %377 : vector<8x96xf32>
    %380 = arith.divf %378, %379 : vector<8x96xf32>
    %381 = vector.extract_strided_slice %374 {offsets = [0, 96], sizes = [8, 32], strides = [1, 1]} : vector<8x128xf32> to vector<8x32xf32>
    %382 = math.tanh %381 : vector<8x32xf32>
    %383 = vector.extract_strided_slice %380 {offsets = [0, 0], sizes = [8, 32], strides = [1, 1]} : vector<8x96xf32> to vector<8x32xf32>
    %384 = vector.extract_strided_slice %380 {offsets = [0, 32], sizes = [8, 32], strides = [1, 1]} : vector<8x96xf32> to vector<8x32xf32>
    %385 = vector.extract_strided_slice %380 {offsets = [0, 64], sizes = [8, 32], strides = [1, 1]} : vector<8x96xf32> to vector<8x32xf32>
    %386 = arith.mulf %384, %345 : vector<8x32xf32>
    %387 = arith.mulf %383, %382 : vector<8x32xf32>
    %388 = arith.addf %386, %387 : vector<8x32xf32>
    %389 = math.tanh %388 : vector<8x32xf32>
    %390 = arith.mulf %385, %389 : vector<8x32xf32>
    %c7_i32 = arith.constant 7 : i32
    %391 = arith.index_cast %c7_i32 : i32 to index
    %c0_129 = arith.constant 0 : index
    %c0_130 = arith.constant 0 : index
    %392 = vector.load %arg17[%391, %c0_129, %c0_130] : memref<8x8x128xf32, #tpu.memory_space<vmem>>, vector<1x8x128xf32>
    %393 = vector.shape_cast %392 : vector<1x8x128xf32> to vector<8x128xf32>
    %394 = arith.truncf %369 : vector<8x32xf32> to vector<8x32xbf16>
    %cst_131 = arith.constant dense<0.000000e+00> : vector<8x128xf32>
    %395 = tpu.matmul %394, %85, %cst_131 {dimension_numbers = #tpu.dot_dimension_numbers<[1], [0], [0], [1], [0, 0, 1, 1], [], []>} : vector<8x32xbf16>, vector<32x128xbf16>, vector<8x128xf32> -> vector<8x128xf32>
    %396 = arith.addf %393, %395 : vector<8x128xf32>
    %397 = vector.extract_strided_slice %396 {offsets = [0, 0], sizes = [8, 96], strides = [1, 1]} : vector<8x128xf32> to vector<8x96xf32>
    %398 = arith.negf %397 : vector<8x96xf32>
    %399 = math.exp %398 : vector<8x96xf32>
    %cst_132 = arith.constant 1.000000e+00 : f32
    %400 = vector.broadcast %cst_132 : f32 to vector<8x96xf32>
    %401 = arith.addf %400, %399 : vector<8x96xf32>
    %402 = arith.divf %400, %401 : vector<8x96xf32>
    %403 = vector.extract_strided_slice %396 {offsets = [0, 96], sizes = [8, 32], strides = [1, 1]} : vector<8x128xf32> to vector<8x32xf32>
    %404 = math.tanh %403 : vector<8x32xf32>
    %405 = vector.extract_strided_slice %402 {offsets = [0, 0], sizes = [8, 32], strides = [1, 1]} : vector<8x96xf32> to vector<8x32xf32>
    %406 = vector.extract_strided_slice %402 {offsets = [0, 32], sizes = [8, 32], strides = [1, 1]} : vector<8x96xf32> to vector<8x32xf32>
    %407 = vector.extract_strided_slice %402 {offsets = [0, 64], sizes = [8, 32], strides = [1, 1]} : vector<8x96xf32> to vector<8x32xf32>
    %408 = arith.mulf %406, %367 : vector<8x32xf32>
    %409 = arith.mulf %405, %404 : vector<8x32xf32>
    %410 = arith.addf %408, %409 : vector<8x32xf32>
    %411 = math.tanh %410 : vector<8x32xf32>
    %412 = arith.mulf %407, %411 : vector<8x32xf32>
    %413 = tpu.concatenate %412, %390 in 1 : vector<8x32xf32>, vector<8x32xf32> -> vector<8x64xf32>
    %414 = arith.truncf %413 : vector<8x64xf32> to vector<8x64xbf16>
    %cst_133 = arith.constant dense<0.000000e+00> : vector<8x128xf32>
    %415 = tpu.matmul %414, %87, %cst_133 {dimension_numbers = #tpu.dot_dimension_numbers<[1], [0], [0], [1], [0, 0, 1, 1], [], []>} : vector<8x64xbf16>, vector<64x128xbf16>, vector<8x128xf32> -> vector<8x128xf32>
    %416 = vector.broadcast %88 : vector<1x128xf32> to vector<8x128xf32>
    %417 = arith.addf %415, %416 : vector<8x128xf32>
    %418 = vector.extract_strided_slice %417 {offsets = [0, 0], sizes = [8, 96], strides = [1, 1]} : vector<8x128xf32> to vector<8x96xf32>
    %419 = arith.negf %418 : vector<8x96xf32>
    %420 = math.exp %419 : vector<8x96xf32>
    %cst_134 = arith.constant 1.000000e+00 : f32
    %421 = vector.broadcast %cst_134 : f32 to vector<8x96xf32>
    %422 = arith.addf %421, %420 : vector<8x96xf32>
    %423 = arith.divf %421, %422 : vector<8x96xf32>
    %424 = vector.extract_strided_slice %417 {offsets = [0, 96], sizes = [8, 32], strides = [1, 1]} : vector<8x128xf32> to vector<8x32xf32>
    %425 = math.tanh %424 : vector<8x32xf32>
    %426 = vector.extract_strided_slice %423 {offsets = [0, 0], sizes = [8, 32], strides = [1, 1]} : vector<8x96xf32> to vector<8x32xf32>
    %427 = vector.extract_strided_slice %423 {offsets = [0, 32], sizes = [8, 32], strides = [1, 1]} : vector<8x96xf32> to vector<8x32xf32>
    %428 = vector.extract_strided_slice %423 {offsets = [0, 64], sizes = [8, 32], strides = [1, 1]} : vector<8x96xf32> to vector<8x32xf32>
    %429 = arith.mulf %427, %388 : vector<8x32xf32>
    %430 = arith.mulf %426, %425 : vector<8x32xf32>
    %431 = arith.addf %429, %430 : vector<8x32xf32>
    %432 = math.tanh %431 : vector<8x32xf32>
    %433 = arith.mulf %428, %432 : vector<8x32xf32>
    %c8_i32 = arith.constant 8 : i32
    %434 = arith.truncf %433 : vector<8x32xf32> to vector<8x32xbf16>
    %c0_135 = arith.constant 0 : index
    %c0_136 = arith.constant 0 : index
    %435 = vector.load %arg12[%c0_135, %c0_136] : memref<32x1xf32, #tpu.memory_space<vmem>>, vector<32x1xf32>
    %436 = arith.truncf %435 : vector<32x1xf32> to vector<32x1xbf16>
    %cst_137 = arith.constant dense<0.000000e+00> : vector<8x1xf32>
    %437 = tpu.matmul %434, %436, %cst_137 {dimension_numbers = #tpu.dot_dimension_numbers<[1], [0], [0], [1], [0, 0, 1, 1], [], []>} : vector<8x32xbf16>, vector<32x1xbf16>, vector<8x1xf32> -> vector<8x1xf32>
    %c0_138 = arith.constant 0 : index
    %c0_139 = arith.constant 0 : index
    %438 = vector.load %arg13[%c0_138, %c0_139] : memref<1x1xf32, #tpu.memory_space<vmem>>, vector<1x1xf32>
    %439 = vector.broadcast %438 : vector<1x1xf32> to vector<8x1xf32>
    %440 = arith.addf %437, %439 : vector<8x1xf32>
    %c0_140 = arith.constant 0 : index
    %c0_141 = arith.constant 0 : index
    %441 = vector.load %arg14[%c0_140, %c0_141] : memref<8x1xf32, #tpu.memory_space<vmem>>, vector<8x1xf32>
    tpu.vector_store %arg14[%c0_140, %c0_141], %440 {strides = array<i32>} : memref<8x1xf32, #tpu.memory_space<vmem>>, vector<8x1xf32>,
    return
  }
}

</mosaic_0001>

<bundles_post_ra>
// kernel: _lambda_.1
= control target key start
LH: loop header
LB: loop body
LE: loop exit
PB: predicated region body
PF: predicated region fallthrough
CT: control target
= control target key end

     0   :  { %s2802_s0 = inlined_call_operand.vmem [shape: f32[8,8,16], index: 0, kind: input, shape index: {}]   ;;  %s2803_s1 = inlined_call_operand.vmem [shape: f32[3,16,64], index: 1, kind: input, shape index: {}]   ;;  %s2804_s2 = inlined_call_operand.vmem [shape: f32[1,64], index: 2, kind: input, shape index: {}]   ;;  %s2805_s3 = inlined_call_operand.vmem [shape: f32[1,64], index: 3, kind: input, shape index: {}]   ;;  %s2806_s4 = inlined_call_operand.hbm [shape: f32[3,64,32], index: 4, kind: input, shape index: {}]   ;;  %s2807_s5 = inlined_call_operand.vmem [shape: f32[1,32], index: 5, kind: input, shape index: {}]   ;;  %s2808_s6 = inlined_call_operand.vmem [shape: f32[1,32], index: 6, kind: input, shape index: {}]   ;;  %s2809_s7 = inlined_call_operand.hbm [shape: f32[32,128], index: 7, kind: input, shape index: {}]   ;;  %s2810_s8 = inlined_call_operand.hbm [shape: f32[32,128], index: 8, kind: input, shape index: {}]   ;;  %s2811_s9 = inlined_call_operand.vmem [shape: f32[1,128], index: 9, kind: input, shape index: {}]   ;;  %s2812_s10 = inlined_call_operand.vmem [shape: f32[64,128], index: 10, kind: input, shape index: {}]   ;;  %s2813_s11 = inlined_call_operand.vmem [shape: f32[1,128], index: 11, kind: input, shape index: {}]   ;;  %s2814_s12 = inlined_call_operand.hbm [shape: f32[32,1], index: 12, kind: input, shape index: {}]   ;;  %s2815_s13 = inlined_call_operand.<no memory space> [shape: f32[1,1], index: 13, kind: input, shape index: {}]   ;;  %s2816_s14 = inlined_call_operand.vmem [shape: f32[8,1], index: 14, kind: output, shape index: {}]  }
   0x1   :  { %v19_v0 = vstv %s2815_s13 }
   0x2   :  { %20 = vst [vmem:[#allocation5] sm:$0x1] %v19_v0 }
   0x3   :  { %21 = vsyncpa [#allocation7], 0 }
   0x4   :  { %22 = vsyncpa [#allocation9], 0 }
   0x5   :  { %23 = vsyncpa [#allocation12], 0  ;;  %s53_s17 = sshll.u32 %s2809_s7, 4  ;;  %s2267_s18 = smov [#allocation8]   ;;  %s54_s17 = int_to_ptr.hbm [resolvable:$true] %s53_s17 }
   0x6   :  { %s55_s19 = sshll.u32 %s2267_s18, 4  ;;  %s36_s22 = sshll.u32 %s2806_s4, 4  ;;  %s56_s19 = int_to_ptr.vmem [resolvable:$true] %s55_s19  ;;  %s37_s22 = int_to_ptr.hbm [resolvable:$true] %s36_s22 }
   0x7   :  { %s2268_s23 = smov 128   ;;  %s2269_s24 = smov 8  }
   0x8   :  { %61 = dma.hbm_to_vmem [thread:$0]  %s54_s17, 512, %s56_s19, [#allocation9], %s2268_s23, %s2268_s23, %s2269_s24  }
   0x9   :  { %s2270_s13 = smov [#allocation6]   ;;  %s66_s28 = sshll.u32 %s2810_s8, 4  ;;  %s67_s28 = int_to_ptr.hbm [resolvable:$true] %s66_s28 }
   0xa   :  { %s38_s25 = sshll.u32 %s2270_s13, 4  ;;  %s85_s30 = sshll.u32 %s2814_s12, 4  ;;  %s39_s25 = int_to_ptr.vmem [resolvable:$true] %s38_s25  ;;  %s86_s30 = int_to_ptr.hbm [resolvable:$true] %s85_s30 }
   0xb   :  { %44 = dma.hbm_to_vmem [thread:$0]  %s37_s22, 3072, %s39_s25, [#allocation7], %s2268_s23, %s2268_s23, %s2269_s24  }
   0xc   :  { %s2271_s15 = smov [#allocation10]   ;;  %s2272_s4 = smov [#allocation11]  }
   0xd   :  { %s68_s16 = sshll.u32 %s2271_s15, 4  ;;  %s87_s17 = sshll.u32 %s2272_s4, 4  ;;  %s69_s16 = int_to_ptr.vmem [resolvable:$true] %s68_s16  ;;  %s88_s17 = int_to_ptr.vmem [resolvable:$true] %s87_s17 }
   0xe   :  { %74 = dma.hbm_to_vmem [thread:$0]  %s67_s28, 512, %s69_s16, [#allocation9], %s2268_s23, %s2268_s23, %s2269_s24  }
   0xf   :  { %93 = dma.hbm_to_vmem [thread:$0]  %s86_s30, 512, %s88_s17, [#allocation12], %s2268_s23, %s2268_s23, %s2269_s24  }
  0x10   :  { %2261 = dma.done.wait [#allocation7], 3072  }
  0x11   :  { %2262 = vsyncadd [#allocation7], 4294964224 }
  0x12   :  { %2263 = dma.done.wait [#allocation9], 1024  }
  0x13   :  { %2264 = vsyncadd [#allocation9], 4294966272 }
  0x14   :  { %2265 = dma.done.wait [#allocation12], 512  }
  0x15   :  { %2266 = vsyncadd [#allocation12], 4294966784  ;;  %vm121_vm0 = vcmask 125952   ;;  %v2273_v1 = vmov 0   ;;  %v1834_v2 = vld [vmem:[%s2803_s1 + $0x10] sm:$0xff]  ;;  %v1835_v3 = vld [vmem:[%s2803_s1 + $0x18] sm:$0xff] }
  0x16   :  { %122 = vst.msk [vmem:[#allocation2] sm:$0xf] %vm121_vm0, %v2273_v1  ;;  %v150_v4 = vld [vmem:[%s2803_s1] sm:$0xff]  ;;  %v164_v5 = vpack.c.bf16 %v1835_v3, %v1834_v2  ;;  %v151_v6 = vld [vmem:[%s2803_s1 + $0x8] sm:$0xff]  ;;  %v115_v13 = vld [vmem:[%s2802_s0 + $0x10] sm:$0xff]  ;;  %vm185_vm1 = vcmask 130048  }
  0x17   :  { %124 = vst.msk [vmem:[#allocation2 + $0x24] sm:$0xf] %vm121_vm0, %v2273_v1  ;;  %v1876_v7 = vld [vmem:[%s2803_s1 + $0x20] sm:$0xff]  ;;  %v1877_v8 = vld [vmem:[%s2803_s1 + $0x28] sm:$0xff]  ;;  %v152_v9 = vpack.c.bf16 %v151_v6, %v150_v4  ;;  %v127_v16 = vpack.c.bf16 %v115_v13, %v115_v13  ;;  %v116_v17 = vld [vmem:[%s2802_s0 + $0x18] sm:$0xff]  ;;  %vm402_vm2 = vcmask 519168  }
  0x18   :  { %v300_v10 = vpack.c.bf16 %v1877_v8, %v1876_v7  ;;  %v113_v11 = vld [vmem:[%s2802_s0] sm:$0xff]  ;;  %v114_v12 = vld [vmem:[%s2802_s0 + $0x8] sm:$0xff]  ;;  %205 = vmatpush.bf16.msra.mxu0 %v164_v5  ;;  %v128_v20 = vpack.c.bf16 %v116_v17, %v116_v17  ;;  %v119_v21 = vld [vmem:[%s2802_s0 + $0x30] sm:$0xff]  ;;  %403 = vst.msk [vmem:[#allocation3] sm:$0xf] %vm402_vm2, %v2273_v1  ;;  %vm484_vm3 = vcmask 523264  }
  0x19   :  { %v125_v14 = vpack.c.bf16 %v113_v11, %v113_v11  ;;  %v126_v15 = vpack.c.bf16 %v114_v12, %v114_v12  ;;  %v117_v18 = vld [vmem:[%s2802_s0 + $0x20] sm:$0xff]  ;;  %v118_v19 = vld [vmem:[%s2802_s0 + $0x28] sm:$0xff]  ;;  %266 = vmatpush.bf16.msra.mxu1 %v152_v9  ;;  %136 = vst.msk [vmem:[#allocation2 + $0xc] sm:$0xf] %vm121_vm0, %v127_v16  ;;  %v131_v24 = vpack.c.bf16 %v119_v21, %v119_v21  ;;  %v120_v28 = vld [vmem:[%s2802_s0 + $0x38] sm:$0xff]  ;;  %vm748_vm4 = vcmask 261120  }
  0x1a   :  { %340 = vmatpush.bf16.msra.mxu2 %v300_v10  ;;  %v129_v22 = vpack.c.bf16 %v117_v18, %v117_v18  ;;  %v130_v23 = vpack.c.bf16 %v118_v19, %v118_v19  ;;  %137 = vst.msk [vmem:[#allocation2 + $0x10] sm:$0xf] %vm121_vm0, %v128_v20  ;;  %v132_v29 = vpack.c.bf16 %v120_v28, %v120_v28  ;;  %v437_v33 = vld [vmem:[#allocation6 + $0x30] sm:$0xff]  ;;  %v438_v34 = vld [vmem:[#allocation6 + $0x38] sm:$0xff]  ;;  %v435_v39 = vld [vmem:[#allocation6 + $0x20] sm:$0xff]  ;;  %s2274_s26 = smov 32  }
  0x1b   :  { %134 = vst.msk [vmem:[#allocation2 + $0x4] sm:$0xf] %vm121_vm0, %v125_v14  ;;  %v603_v35 = vld [vmem:[#allocation6 + $0xb0] sm:$0xff]  ;;  %v604_v36 = vld [vmem:[#allocation6 + $0xb8] sm:$0xff]  ;;  %v442_v37 = vpack.c.bf16 %v438_v34, %v437_v33  ;;  %v436_v40 = vld [vmem:[#allocation6 + $0x28] sm:$0xff]  ;;  %s2275_s27 = smov 64  }
  0x1c   :  { %135 = vst.msk [vmem:[#allocation2 + $0x8] sm:$0xf] %vm121_vm0, %v126_v15  ;;  %v608_v38 = vpack.c.bf16 %v604_v36, %v603_v35  ;;  %v601_v41 = vld [vmem:[#allocation6 + $0xa0] sm:$0xff]  ;;  %v602_v42 = vld [vmem:[#allocation6 + $0xa8] sm:$0xff]  ;;  %v441_v43 = vpack.c.bf16 %v436_v40, %v435_v39  ;;  %v433_v51 = vld [vmem:[#allocation6 + $0x10] sm:$0xff]  ;;  %s2276_s23 = smov 96  }
  0x1d   :  { %138 = vst.msk [vmem:[#allocation2 + $0x14] sm:$0xf] %vm121_vm0, %v129_v22  ;;  %562 = vmatpush.bf16.msrb.mxu0 %v442_v37  ;;  %v607_v44 = vpack.c.bf16 %v602_v42, %v601_v41  ;;  %v434_v52 = vld [vmem:[#allocation6 + $0x18] sm:$0xff]  ;;  %v458_v53 = vld [vmem:[#allocation6 + $0x70] sm:$0xff]  ;;  %v456_v60 = vld [vmem:[#allocation6 + $0x60] sm:$0xff] }
  0x1e   :  { %139 = vst.msk [vmem:[#allocation2 + $0x18] sm:$0xf] %vm121_vm0, %v130_v23  ;;  %645 = vmatpush.bf16.msrb.mxu1 %v608_v38  ;;  %v440_v54 = vpack.c.bf16 %v434_v52, %v433_v51  ;;  %v599_v55 = vld [vmem:[#allocation6 + $0x90] sm:$0xff]  ;;  %v600_v56 = vld [vmem:[#allocation6 + $0x98] sm:$0xff]  ;;  %v457_v61 = vld [vmem:[#allocation6 + $0x68] sm:$0xff] }
  0x1f   :  { %140 = vst.msk [vmem:[#allocation2 + $0x1c] sm:$0xf] %vm121_vm0, %v131_v24  ;;  %v459_v57 = vld [vmem:[#allocation6 + $0x78] sm:$0xff]  ;;  %v606_v58 = vpack.c.bf16 %v600_v56, %v599_v55  ;;  %v431_v62 = vld [vmem:[#allocation6] sm:$0xff]  ;;  %v462_v63 = vpack.c.bf16 %v457_v61, %v456_v60  ;;  %v432_v0 = vld [vmem:[#allocation6 + $0x8] sm:$0xff] }
  0x20   :  { %141 = vst.msk [vmem:[#allocation2 + $0x20] sm:$0xf] %vm121_vm0, %v132_v29  ;;  %v463_v59 = vpack.c.bf16 %v459_v57, %v458_v53  ;;  %v439_v2 = vpack.c.bf16 %v432_v0, %v431_v62  ;;  %v454_v3 = vld [vmem:[#allocation6 + $0x50] sm:$0xff]  ;;  %v455_v4 = vld [vmem:[#allocation6 + $0x58] sm:$0xff]  ;;  %v452_v6 = vld [vmem:[#allocation6 + $0x40] sm:$0xff] }
  0x21   :  { %v1999_v31 = vld [vmem:[#allocation2 + $0xc] sm:$0xff]  ;;  %563 = vmatpush.bf16.msrb.mxu0 %v441_v43  ;;  %405 = vst.msk [vmem:[#allocation3 + $0x24] sm:$0xf] %vm402_vm2, %v2273_v1  ;;  %v461_v5 = vpack.c.bf16 %v455_v4, %v454_v3  ;;  %v453_v7 = vld [vmem:[#allocation6 + $0x48] sm:$0xff]  ;;  %v720_v62 = vld [vmem:[#allocation8 + $0x10] sm:$0xff] }
  0x22   :  { %v1994_v25 = vld [vmem:[#allocation2] sm:$0xff]  ;;  %646 = vmatpush.bf16.msrb.mxu1 %v607_v44  ;;  %501 = vmatpush.bf16.msra.mxu3 %v463_v59  ;;  %v460_v8 = vpack.c.bf16 %v453_v7, %v452_v6  ;;  %v597_v11 = vld [vmem:[#allocation6 + $0x80] sm:$0xff] }
  0x23   :  { %v1998_v26 = vld [vmem:[#allocation2 + $0x4] sm:$0xff]  ;;  %1872 = vmatmul.msk.bf16.vlgmr.msra.gmra.mxu1 %vm185_vm1, %v1994_v25  ;;  %v598_v12 = vld [vmem:[#allocation6 + $0x88] sm:$0xff] }
  0x24   :  { %v2002_v27 = vld [vmem:[#allocation2 + $0x8] sm:$0xff]  ;;  %1852 = vmatmul.msk.bf16.vlgmr.msra.gmra.mxu0 %vm185_vm1, %v1998_v26  ;;  %v2003_v32 = vld [vmem:[#allocation2 + $0x10] sm:$0xff]  ;;  %v605_v13 = vpack.c.bf16 %v598_v12, %v597_v11  ;;  %v2440_v15 = vld [vmem:[%s2804_s2] ss:$0 sm:$0xff] }
  0x25   :  { %1894 = vmatmul.msk.bf16.vlgmr.msra.gmra.mxu2 %vm185_vm1, %v2002_v27  ;;  %v1995_v30 = vld [vmem:[#allocation2 + $0x8] sm:$0xff]  ;;  %v1996_v45 = vld [vmem:[#allocation2 + $0x10] sm:$0xff]  ;;  %564 = vmatpush.bf16.msrb.mxu0 %v440_v54  ;;  %v2445_v19 = vld [vmem:[%s2805_s3] ss:$0 sm:$0xff] }
  0x26   :  { %v2000_v46 = vld [vmem:[#allocation2 + $0x14] sm:$0xff]  ;;  %647 = vmatpush.bf16.msrb.mxu1 %v606_v58  ;;  %502 = vmatpush.bf16.msra.mxu3 %v462_v63  ;;  %v721_v63 = vld [vmem:[#allocation8 + $0x18] sm:$0xff]  ;;  %v800_v0 = vld [vmem:[#allocation10 + $0x10] sm:$0xff] }
  0x27   :  { %v2004_v47 = vld [vmem:[#allocation2 + $0x18] sm:$0xff]  ;;  %v2005_v50 = vld [vmem:[#allocation2 + $0x20] sm:$0xff]  ;;  %v723_v4 = vpack.c.bf16 %v721_v63, %v720_v62 }
  0x28   :  { %v1997_v48 = vld [vmem:[#allocation2 + $0x18] sm:$0xff] }
  0x29   :  { %v2001_v49 = vld [vmem:[#allocation2 + $0x1c] sm:$0xff]  ;;  %565 = vmatpush.bf16.msrb.mxu0 %v439_v2  ;;  %767 = vmatpush.bf16.msrb.mxu2 %v723_v4 }
  0x2a   :  { %503 = vmatpush.bf16.msra.mxu3 %v461_v5  ;;  %648 = vmatpush.bf16.msrb.mxu1 %v605_v13  ;;  %v801_v5 = vld [vmem:[#allocation10 + $0x18] sm:$0xff] }
  0x2b   :  { %v2465_v6 = vpack.c.bf16 %v801_v5, %v800_v0 }
  0x2d   :  { %1072 = vmatpush.bf16.msra.mxu0 %v2465_v6 }
  0x2e   :  { %504 = vmatpush.bf16.msra.mxu3 %v460_v8 }
  0x32   :  { %827 = vmatpush.bf16.msrb.mxu3 %v2465_v6 }
  0x33   :  { %1873 = vmatmul.msk.bf16.gmra.mxu1 %vm185_vm1, %v1995_v30 }
  0x34   :  { %1853 = vmatmul.msk.bf16.gmra.mxu0 %vm185_vm1, %v1999_v31 }
  0x35   :  { %1895 = vmatmul.msk.bf16.gmra.mxu2 %vm185_vm1, %v2003_v32 }
  0x43   :  { %1874 = vmatmul.msk.bf16.gmra.mxu1 %vm185_vm1, %v1996_v45 }
  0x44   :  { %1854 = vmatmul.msk.bf16.gmra.mxu0 %vm185_vm1, %v2000_v46 }
  0x45   :  { %1896 = vmatmul.msk.bf16.gmra.mxu2 %vm185_vm1, %v2004_v47 }
  0x53   :  { %1875 = vmatmul.msk.bf16.gmra.mxu1 %vm185_vm1, %v1997_v48 }
  0x54   :  { %1855 = vmatmul.msk.bf16.gmra.mxu0 %vm185_vm1, %v2001_v49 }
  0x55   :  { %1897 = vmatmul.msk.bf16.gmra.mxu2 %vm185_vm1, %v2005_v50 }
  0xa0   :  { %v268_v9 = vpop.f32.mrf.mxu1 }
  0xa1   :  { %v207_v10 = vpop.f32.mrf.mxu0 }
  0xa2   :  { %v269_v14 = vadd.f32 %v268_v9, %v207_v10 }
  0xa8   :  { %v342_v16 = vpop.f32.mrf.mxu2  ;;  %v270_v17 = vpop.f32.mrf.mxu1 }
  0xa9   :  { %v362_v18 = vadd.f32 %v342_v16, %v269_v14  ;;  %v209_v20 = vpop.f32.mrf.mxu0 }
  0xaa   :  { %v271_v24 = vadd.f32 %v270_v17, %v209_v20 }
  0xab   :  { %v374_v21 = vmul.f32 %v2440_v15, %v362_v18 }
  0xad   :  { %v386_v22 = vadd.f32 %v2445_v19, %v374_v21 }
  0xaf   :  { %v394_v23 = vmax.f32 %v386_v22, 0.0 }
  0xb0   :  { %v344_v25 = vpop.f32.mrf.mxu2  ;;  %v273_v26 = vpop.f32.mrf.mxu1 }
  0xb1   :  { %v406_v27 = vpack.c.bf16 %v394_v23, %v394_v23  ;;  %v363_v28 = vadd.f32 %v344_v25, %v271_v24  ;;  %v212_v29 = vpop.f32.mrf.mxu0 }
  0xb2   :  { %v274_v32 = vadd.f32 %v273_v26, %v212_v29 }
  0xb3   :  { %415 = vst.msk [vmem:[#allocation3 + $0x4] sm:$0xf] %vm402_vm2, %v406_v27  ;;  %v375_v30 = vmul.f32 %v2440_v15, %v363_v28 }
  0xb5   :  { %v387_v31 = vadd.f32 %v2445_v19, %v375_v30 }
  0xb7   :  { %v395_v33 = vmax.f32 %v387_v31, 0.0 }
  0xb8   :  { %v347_v34 = vpop.f32.mrf.mxu2  ;;  %v275_v35 = vpop.f32.mrf.mxu1 }
  0xb9   :  { %v407_v36 = vpack.c.bf16 %v395_v33, %v395_v33  ;;  %v364_v37 = vadd.f32 %v347_v34, %v274_v32  ;;  %v214_v38 = vpop.f32.mrf.mxu0 }
  0xba   :  { %v2006_v39 = vld [vmem:[#allocation3] sm:$0xff]  ;;  %v276_v43 = vadd.f32 %v275_v35, %v214_v38 }
  0xbb   :  { %416 = vst.msk [vmem:[#allocation3 + $0x8] sm:$0xf] %vm402_vm2, %v407_v36  ;;  %v376_v40 = vmul.f32 %v2440_v15, %v364_v37  ;;  %1934 = vmatmul.msk.bf16.vlgmr.msrb.gmra.mxu0 %vm484_vm3, %v2006_v39 }
  0xbd   :  { %v388_v41 = vadd.f32 %v2445_v19, %v376_v40 }
  0xbf   :  { %v396_v42 = vmax.f32 %v388_v41, 0.0 }
  0xc0   :  { %v349_v44 = vpop.f32.mrf.mxu2  ;;  %v278_v45 = vpop.f32.mrf.mxu1 }
  0xc1   :  { %v408_v46 = vpack.c.bf16 %v396_v42, %v396_v42  ;;  %v365_v47 = vadd.f32 %v349_v44, %v276_v43  ;;  %v217_v48 = vpop.f32.mrf.mxu0  ;;  %v719_v43 = vld [vmem:[#allocation8 + $0x8] sm:$0xff] }
  0xc2   :  { %v2010_v49 = vld [vmem:[#allocation3 + $0x4] sm:$0xff]  ;;  %v279_v52 = vadd.f32 %v278_v45, %v217_v48  ;;  %v799_v45 = vld [vmem:[#allocation10 + $0x8] sm:$0xff] }
  0xc3   :  { %417 = vst.msk [vmem:[#allocation3 + $0xc] sm:$0xf] %vm402_vm2, %v408_v46  ;;  %v377_v50 = vmul.f32 %v2440_v15, %v365_v47  ;;  %1914 = vmatmul.msk.bf16.vlgmr.msra.gmra.mxu3 %vm484_vm3, %v2010_v49 }
  0xc5   :  { %v389_v51 = vadd.f32 %v2445_v19, %v377_v50 }
  0xc7   :  { %v397_v53 = vmax.f32 %v389_v51, 0.0  ;;  %v2499_v51 = vld [vmem:[%s2807_s5] ss:$0 sm:$0xff] }
  0xc8   :  { %v352_v54 = vpop.f32.mrf.mxu2  ;;  %v280_v55 = vpop.f32.mrf.mxu1 }
  0xc9   :  { %v409_v56 = vpack.c.bf16 %v397_v53, %v397_v53  ;;  %v366_v57 = vadd.f32 %v352_v54, %v279_v52  ;;  %v219_v58 = vpop.f32.mrf.mxu0 }
  0xca   :  { %v2007_v59 = vld [vmem:[#allocation3 + $0x8] sm:$0xff]  ;;  %v281_v3 = vadd.f32 %v280_v55, %v219_v58  ;;  %v2505_v55 = vld [vmem:[%s2808_s6] ss:$0 sm:$0xff] }
  0xcb   :  { %v2014_v60 = vld [vmem:[#allocation3 + $0x8] sm:$0xff]  ;;  %418 = vst.msk [vmem:[#allocation3 + $0x10] sm:$0xf] %vm402_vm2, %v409_v56  ;;  %v378_v61 = vmul.f32 %v2440_v15, %v366_v57  ;;  %1935 = vmatmul.msk.bf16.gmra.mxu0 %vm484_vm3, %v2007_v59 }
  0xcc   :  { %1954 = vmatmul.msk.bf16.vlgmr.msrb.gmra.mxu1 %vm484_vm3, %v2014_v60 }
  0xcd   :  { %v390_v2 = vadd.f32 %v2445_v19, %v378_v61 }
  0xcf   :  { %v398_v7 = vmax.f32 %v390_v2, 0.0 }
  0xd0   :  { %v354_v8 = vpop.f32.mrf.mxu2  ;;  %v283_v13 = vpop.f32.mrf.mxu1 }
  0xd1   :  { %v410_v9 = vpack.c.bf16 %v398_v7, %v398_v7  ;;  %v367_v10 = vadd.f32 %v354_v8, %v281_v3  ;;  %v222_v12 = vpop.f32.mrf.mxu0 }
  0xd2   :  { %v2011_v11 = vld [vmem:[#allocation3 + $0xc] sm:$0xff]  ;;  %v284_v17 = vadd.f32 %v283_v13, %v222_v12 }
  0xd3   :  { %419 = vst.msk [vmem:[#allocation3 + $0x14] sm:$0xf] %vm402_vm2, %v410_v9  ;;  %v379_v14 = vmul.f32 %v2440_v15, %v367_v10  ;;  %1915 = vmatmul.msk.bf16.gmra.mxu3 %vm484_vm3, %v2011_v11 }
  0xd5   :  { %v391_v16 = vadd.f32 %v2445_v19, %v379_v14 }
  0xd7   :  { %v399_v18 = vmax.f32 %v391_v16, 0.0 }
  0xd8   :  { %v357_v20 = vpop.f32.mrf.mxu2  ;;  %v285_v26 = vpop.f32.mrf.mxu1 }
  0xd9   :  { %v411_v21 = vpack.c.bf16 %v399_v18, %v399_v18  ;;  %v368_v22 = vadd.f32 %v357_v20, %v284_v17  ;;  %v224_v25 = vpop.f32.mrf.mxu0 }
  0xda   :  { %v2008_v23 = vld [vmem:[#allocation3 + $0x10] sm:$0xff]  ;;  %v286_v29 = vadd.f32 %v285_v26, %v224_v25 }
  0xdb   :  { %v2015_v24 = vld [vmem:[#allocation3 + $0x10] sm:$0xff]  ;;  %420 = vst.msk [vmem:[#allocation3 + $0x18] sm:$0xf] %vm402_vm2, %v411_v21  ;;  %v380_v27 = vmul.f32 %v2440_v15, %v368_v22  ;;  %1936 = vmatmul.msk.bf16.gmra.mxu0 %vm484_vm3, %v2008_v23 }
  0xdc   :  { %1955 = vmatmul.msk.bf16.gmra.mxu1 %vm484_vm3, %v2015_v24 }
  0xdd   :  { %v392_v28 = vadd.f32 %v2445_v19, %v380_v27 }
  0xdf   :  { %v400_v30 = vmax.f32 %v392_v28, 0.0 }
  0xe0   :  { %v359_v31 = vpop.f32.mrf.mxu2 }
  0xe1   :  { %v412_v32 = vpack.c.bf16 %v400_v30, %v400_v30  ;;  %v369_v33 = vadd.f32 %v359_v31, %v286_v29 }
  0xe2   :  { %v2012_v34 = vld [vmem:[#allocation3 + $0x14] sm:$0xff] }
  0xe3   :  { %421 = vst.msk [vmem:[#allocation3 + $0x1c] sm:$0xf] %vm402_vm2, %v412_v32  ;;  %v381_v35 = vmul.f32 %v2440_v15, %v369_v33  ;;  %1916 = vmatmul.msk.bf16.gmra.mxu3 %vm484_vm3, %v2012_v34  ;;  %v718_v15 = vld [vmem:[#allocation8] sm:$0xff] }
  0xe4   :  { %v722_v44 = vpack.c.bf16 %v719_v43, %v718_v15 }
  0xe5   :  { %v393_v36 = vadd.f32 %v2445_v19, %v381_v35  ;;  %v798_v19 = vld [vmem:[#allocation10] sm:$0xff] }
  0xe6   :  { %768 = vmatpush.bf16.msrb.mxu2 %v722_v44  ;;  %v2488_v46 = vpack.c.bf16 %v799_v45, %v798_v19 }
  0xe7   :  { %v401_v37 = vmax.f32 %v393_v36, 0.0 }
  0xe8   :  { %828 = vmatpush.bf16.msrb.mxu3 %v2488_v46  ;;  %1073 = vmatpush.bf16.msra.mxu0 %v2488_v46 }
  0xe9   :  { %v413_v38 = vpack.c.bf16 %v401_v37, %v401_v37 }
  0xea   :  { %v2016_v39 = vld [vmem:[#allocation3 + $0x18] sm:$0xff]  ;;  %1195 = vmatpush.bf16.msra.mxu2 %v2465_v6 }
  0xeb   :  { %v2009_v40 = vld [vmem:[#allocation3 + $0x18] sm:$0xff]  ;;  %422 = vst.msk [vmem:[#allocation3 + $0x20] sm:$0xf] %vm402_vm2, %v413_v38 }
  0xec   :  { %1956 = vmatmul.msk.bf16.gmra.mxu1 %vm484_vm3, %v2016_v39  ;;  %1937 = vmatmul.msk.bf16.gmra.mxu0 %vm484_vm3, %v2009_v40 }
  0xed   :  { %1318 = vmatpush.bf16.msrb.mxu0 %v2465_v6 }
  0xee   :  { %1196 = vmatpush.bf16.msra.mxu2 %v2488_v46 }
  0xf1   :  { %1319 = vmatpush.bf16.msrb.mxu0 %v2488_v46 }
  0xf2   :  { %v2013_v41 = vld [vmem:[#allocation3 + $0x1c] sm:$0xff] }
  0xf3   :  { %1917 = vmatmul.msk.bf16.gmra.mxu3 %vm484_vm3, %v2013_v41  ;;  %v2017_v42 = vld [vmem:[#allocation3 + $0x20] sm:$0xff] }
  0xfc   :  { %1957 = vmatmul.msk.bf16.gmra.mxu1 %vm484_vm3, %v2017_v42 }
 0x103   :  { %829 = vmatmul.bf16.vlgmr.msrb.gmra.mxu3 %v2273_v1 }
 0x138   :  { %v567_v47 = vpop.f32.mrf.mxu0 }
 0x140   :  { %v569_v48 = vpop.f32.mrf.mxu0 }
 0x146   :  { %v506_v49 = vpop.f32.mrf.mxu3 }
 0x147   :  { %v568_v50 = vadd.f32 %v567_v47, %v506_v49 }
 0x148   :  { %v572_v1 = vpop.f32.mrf.mxu0 }
 0x149   :  { %v650_v52 = vpop.f32.mrf.mxu1 }
 0x14a   :  { %v670_v53 = vadd.f32 %v650_v52, %v568_v50 }
 0x14c   :  { %v682_v54 = vmul.f32 %v2499_v51, %v670_v53 }
 0x14e   :  { %v508_v56 = vpop.f32.mrf.mxu3  ;;  %v694_v57 = vadd.f32 %v2505_v55, %v682_v54 }
 0x14f   :  { %v570_v58 = vadd.f32 %v569_v48, %v508_v56 }
 0x150   :  { %v702_v61 = vmax.f32 %v694_v57, 0.0  ;;  %v574_v0 = vpop.f32.mrf.mxu0 }
 0x151   :  { %v652_v59 = vpop.f32.mrf.mxu1 }
 0x152   :  { %v671_v60 = vadd.f32 %v652_v59, %v570_v58  ;;  %v710_v3 = vpack.c.bf16 %v702_v61, %v702_v61 }
 0x154   :  { %v683_v62 = vmul.f32 %v2499_v51, %v671_v60  ;;  %v736_v10 = vunpack.c.l.b16 %v710_v3 }
 0x156   :  { %v695_v63 = vadd.f32 %v2505_v55, %v683_v62  ;;  %v511_v2 = vpop.f32.mrf.mxu3 }
 0x157   :  { %v573_v5 = vadd.f32 %v572_v1, %v511_v2 }
 0x158   :  { %v703_v4 = vmax.f32 %v695_v63, 0.0  ;;  %v577_v18 = vpop.f32.mrf.mxu0 }
 0x159   :  { %v655_v7 = vpop.f32.mrf.mxu1 }
 0x15a   :  { %v711_v8 = vpack.c.bf16 %v703_v4, %v703_v4  ;;  %v672_v9 = vadd.f32 %v655_v7, %v573_v5 }
 0x15c   :  { %v737_v11 = vunpack.c.l.b16 %v711_v8  ;;  %v684_v12 = vmul.f32 %v2499_v51, %v672_v9 }
 0x15e   :  { %v744_v13 = vpack.c.b16 %v737_v11, %v736_v10  ;;  %v513_v14 = vpop.f32.mrf.mxu3  ;;  %v696_v16 = vadd.f32 %v2505_v55, %v684_v12  ;;  %v2531_v12 = vld [vmem:[%s2811_s9] ss:$0 sm:$0xff] }
 0x15f   :  { %v575_v17 = vadd.f32 %v574_v0, %v513_v14 }
 0x160   :  { %1958 = vmatmul.msk.bf16.vlgmr.msrb.gmra.mxu2 %vm748_vm4, %v744_v13  ;;  %v704_v22 = vmax.f32 %v696_v16, 0.0  ;;  %v579_v32 = vpop.f32.mrf.mxu0 }
 0x161   :  { %v657_v20 = vpop.f32.mrf.mxu1  ;;  %1441 = vmatpush.bf16.msrb.mxu2 %v2465_v6 }
 0x162   :  { %v673_v21 = vadd.f32 %v657_v20, %v575_v17  ;;  %v712_v26 = vpack.c.bf16 %v704_v22, %v704_v22 }
 0x164   :  { %v685_v23 = vmul.f32 %v2499_v51, %v673_v21  ;;  %v738_v34 = vunpack.c.l.b16 %v712_v26 }
 0x165   :  { %1442 = vmatpush.bf16.msrb.mxu2 %v2488_v46 }
 0x166   :  { %v697_v24 = vadd.f32 %v2505_v55, %v685_v23  ;;  %v516_v25 = vpop.f32.mrf.mxu3 }
 0x167   :  { %v578_v28 = vadd.f32 %v577_v18, %v516_v25 }
 0x168   :  { %v705_v27 = vmax.f32 %v697_v24, 0.0 }
 0x169   :  { %v660_v29 = vpop.f32.mrf.mxu1  ;;  %v582_v42 = vpop.f32.mrf.mxu0 }
 0x16a   :  { %v713_v30 = vpack.c.bf16 %v705_v27, %v705_v27  ;;  %v674_v31 = vadd.f32 %v660_v29, %v578_v28 }
 0x16c   :  { %v686_v33 = vmul.f32 %v2499_v51, %v674_v31  ;;  %v739_v35 = vunpack.c.l.b16 %v713_v30 }
 0x16e   :  { %v745_v36 = vpack.c.b16 %v739_v35, %v738_v34  ;;  %v518_v37 = vpop.f32.mrf.mxu3  ;;  %v698_v38 = vadd.f32 %v2505_v55, %v686_v33 }
 0x16f   :  { %v580_v39 = vadd.f32 %v579_v32, %v518_v37 }
 0x170   :  { %1959 = vmatmul.msk.bf16.gmra.mxu2 %vm748_vm4, %v745_v36  ;;  %v706_v15 = vmax.f32 %v698_v38, 0.0 }
 0x171   :  { %v662_v40 = vpop.f32.mrf.mxu1  ;;  %v584_v56 = vpop.f32.mrf.mxu0 }
 0x172   :  { %v675_v41 = vadd.f32 %v662_v40, %v580_v39  ;;  %v714_v45 = vpack.c.bf16 %v706_v15, %v706_v15 }
 0x174   :  { %v687_v43 = vmul.f32 %v2499_v51, %v675_v41  ;;  %v740_v53 = vunpack.c.l.b16 %v714_v45 }
 0x176   :  { %v699_v44 = vadd.f32 %v2505_v55, %v687_v43  ;;  %v521_v19 = vpop.f32.mrf.mxu3 }
 0x177   :  { %v583_v48 = vadd.f32 %v582_v42, %v521_v19 }
 0x178   :  { %v707_v47 = vmax.f32 %v699_v44, 0.0 }
 0x179   :  { %v665_v49 = vpop.f32.mrf.mxu1 }
 0x17a   :  { %v715_v50 = vpack.c.bf16 %v707_v47, %v707_v47  ;;  %v676_v52 = vadd.f32 %v665_v49, %v583_v48  ;;  %v810_v47 = vld [vmem:[%s2812_s10 + $0x30] sm:$0xff]  ;;  %v811_v48 = vld [vmem:[%s2812_s10 + $0x38] sm:$0xff]  ;;  %v808_v49 = vld [vmem:[%s2812_s10 + $0x20] sm:$0xff] }
 0x17c   :  { %v741_v54 = vunpack.c.l.b16 %v715_v50  ;;  %v688_v1 = vmul.f32 %v2499_v51, %v676_v52  ;;  %v2566_v50 = vpack.c.bf16 %v811_v48, %v810_v47  ;;  %v809_v52 = vld [vmem:[%s2812_s10 + $0x28] sm:$0xff] }
 0x17e   :  { %v746_v57 = vpack.c.b16 %v741_v54, %v740_v53  ;;  %v700_v58 = vadd.f32 %v2505_v55, %v688_v1  ;;  %v523_v59 = vpop.f32.mrf.mxu3  ;;  %888 = vmatpush.bf16.msra.mxu3 %v2566_v50  ;;  %v2572_v53 = vpack.c.bf16 %v809_v52, %v808_v49  ;;  %1134 = vmatpush.bf16.msra.mxu1 %v2566_v50  ;;  %v806_v54 = vld [vmem:[%s2812_s10 + $0x10] sm:$0xff]  ;;  %v807_v1 = vld [vmem:[%s2812_s10 + $0x18] sm:$0xff] }
 0x17f   :  { %v585_v60 = vadd.f32 %v584_v56, %v523_v59  ;;  %v2582_v56 = vpack.c.bf16 %v807_v1, %v806_v54 }
 0x180   :  { %1960 = vmatmul.msk.bf16.gmra.mxu2 %vm748_vm4, %v746_v57  ;;  %v708_v62 = vmax.f32 %v700_v58, 0.0  ;;  %v804_v57 = vld [vmem:[%s2812_s10] sm:$0xff]  ;;  %v805_v58 = vld [vmem:[%s2812_s10 + $0x8] sm:$0xff] }
 0x181   :  { %v667_v61 = vpop.f32.mrf.mxu1  ;;  %v2592_v59 = vpack.c.bf16 %v805_v58, %v804_v57 }
 0x182   :  { %v677_v63 = vadd.f32 %v667_v61, %v585_v60  ;;  %v716_v2 = vpack.c.bf16 %v708_v62, %v708_v62  ;;  %889 = vmatpush.bf16.msra.mxu3 %v2572_v53  ;;  %1135 = vmatpush.bf16.msra.mxu1 %v2572_v53 }
 0x184   :  { %v689_v0 = vmul.f32 %v2499_v51, %v677_v63  ;;  %v742_v7 = vunpack.c.l.b16 %v716_v2 }
 0x186   :  { %v701_v3 = vadd.f32 %v2505_v55, %v689_v0  ;;  %v830_v10 = vpop.f32.mrf.mxu3  ;;  %890 = vmatpush.bf16.msra.mxu3 %v2582_v56  ;;  %1136 = vmatpush.bf16.msra.mxu1 %v2582_v56  ;;  %v2617_v0 = vld [vmem:[%s2813_s11] ss:$0 sm:$0xff] }
 0x188   :  { %v709_v4 = vmax.f32 %v701_v3, 0.0 }
 0x18a   :  { %v717_v5 = vpack.c.bf16 %v709_v4, %v709_v4  ;;  %891 = vmatpush.bf16.msra.mxu3 %v2592_v59  ;;  %1137 = vmatpush.bf16.msra.mxu1 %v2592_v59 }
 0x18c   :  { %v743_v8 = vunpack.c.l.b16 %v717_v5 }
 0x18e   :  { %v747_v9 = vpack.c.b16 %v743_v8, %v742_v7  ;;  %v832_v11 = vpop.f32.mrf.mxu3  ;;  %949 = vmatpush.bf16.msrb.mxu3 %v2465_v6  ;;  %1380 = vmatpush.bf16.msrb.mxu1 %v2566_v50 }
 0x190   :  { %1961 = vmatmul.msk.bf16.gmra.mxu2 %vm748_vm4, %v747_v9 }
 0x192   :  { %950 = vmatpush.bf16.msrb.mxu3 %v2488_v46  ;;  %1381 = vmatpush.bf16.msrb.mxu1 %v2572_v53 }
 0x196   :  { %1382 = vmatpush.bf16.msrb.mxu1 %v2582_v56 }
 0x19a   :  { %1383 = vmatpush.bf16.msrb.mxu1 %v2592_v59 }
 0x1e3   :  { %v770_v13 = vpop.f32.mrf.mxu2 }
 0x1e4   :  { %v771_v51 = vadd.f32 %v2531_v12, %v770_v13 }
 0x1e6   :  { %v834_v14 = vadd.f32 %v830_v10, %v771_v51 }
 0x1e8   :  { %2035 = vtanh.f32 %v834_v14  ;;  %v1962_v26 = vmul.f32 -1.442695, %v834_v14 }
 0x1ea   :  { %2037 = vpow2.f32 %v1962_v26 }
 0x1eb   :  { %v2534_v55 = vpop.f32.mrf.mxu2 }
 0x1ec   :  { %v773_v7 = vadd.f32 %v2531_v12, %v2534_v55 }
 0x1ee   :  { %v2036_v16 = vpop.eup %2035 }
 0x1ef   :  { %857 = vrot.lane.b32.xlu0 %v2036_v16, %s2274_s26 }
 0x1f0   :  { %v2038_v27 = vpop.eup %2037 }
 0x1f1   :  { %v838_v28 = vadd.f32 1.0, %v2038_v27 }
 0x1f3   :  { %v2537_v17 = vpop.f32.mrf.mxu2  ;;  %2039 = vrcp.f32 %v838_v28  ;;  %v850_v34 = vand.u32 2147483648, %v838_v28  ;;  %vm844_vm6 = vweird.f32 %v838_v28  ;;  %v848_v35 = vand.u32 2147483647, %v838_v28 }
 0x1f5   :  { %v851_v37 = vor.u32 1.1754944e-38, %v850_v34  ;;  %vm849_vm8 = vcmp.eq.f32.partialorder %v848_v35, 8.507059e+37 }
 0x1f9   :  { %v2040_v29 = vpop.eup %2039 }
 0x1fa   :  { %v840_v30 = vmul.f32 %v2040_v29, %v838_v28  ;;  %vm845_vm5 = vweird.f32 %v2040_v29 }
 0x1fb   :  { %v2539_v18 = vpop.f32.mrf.mxu2  ;;  %vm846_vm7 = vmor %vm844_vm6, %vm845_vm5 }
 0x1fc   :  { %v841_v31 = vsub.f32 1.0, %v840_v30 }
 0x1fe   :  { %v842_v32 = vmul.f32 %v2040_v29, %v841_v31 }
 0x200   :  { %v843_v33 = vadd.f32 %v2040_v29, %v842_v32 }
 0x202   :  { %v847_v36 = vsel %vm846_vm7, %v2040_v29, %v843_v33 }
 0x203   :  { %v780_v20 = vpop.f32.mrf.mxu2  ;;  %v852_v39 = vsel %vm849_vm8, %v851_v37, %v847_v36 }
 0x204   :  { %v2542_v21 = vadd.f32 %v2531_v12, %v780_v20  ;;  %v855_v41 = vmul.f32 0.0, %v852_v39 }
 0x20b   :  { %v782_v22 = vpop.f32.mrf.mxu2 }
 0x20c   :  { %v2545_v23 = vadd.f32 %v2531_v12, %v782_v22 }
 0x213   :  { %v785_v24 = vpop.f32.mrf.mxu2 }
 0x214   :  { %v2548_v25 = vadd.f32 %v2531_v12, %v785_v24 }
 0x261   :  { %v858_v38 = vpop.permute.xlu0 %857 }
 0x262   :  { %v860_v40 = vmul.f32 %v858_v38, %v852_v39 }
 0x264   :  { %862 = vrot.lane.b32.xlu0 %v860_v40, %s2274_s26 }
 0x2d6   :  { %v863_v42 = vpop.permute.xlu0 %862 }
 0x2d7   :  { %v2551_v15 = vadd.f32 %v863_v42, %v855_v41 }
 0x2d9   :  { %2041 = vtanh.f32 %v2551_v15 }
 0x2df   :  { %v2042_v43 = vpop.eup %2041 }
 0x2e0   :  { %868 = vrot.lane.b32.xlu1 %v2042_v43, %s2274_s26 }
 0x352   :  { %v869_v44 = vpop.permute.xlu1 %868 }
 0x353   :  { %v871_v19 = vmul.f32 %v869_v44, %v852_v39 }
 0x355   :  { %873 = vrot.lane.b32.xlu1 %v871_v19, %s2275_s27  ;;  %v936_v45 = vpack.c.bf16 %v871_v19, %v871_v19 }
 0x357   :  { %938 = vrot.lane.b32.xlu2 %v936_v45, %s2275_s27 }
 0x3b1   :  { %v939_v63 = vpop.permute.xlu2 %938 }
 0x3c7   :  { %v874_v60 = vpop.permute.xlu1 %873 }
 0x3c8   :  { %v876_v61 = vsel %vm748_vm4, %v874_v60, 0.0 }
 0x3c9   :  { %v877_v62 = vpack.c.bf16 %v876_v61, %v876_v61 }
 0x3cb   :  { %1963 = vmatmul.msk.bf16.vlgmr.msra.gmra.mxu3 %vm484_vm3, %v877_v62 }
 0x3cc   :  { %1011 = vmatpush.bf16.msra.mxu3 %v2566_v50 }
 0x3d0   :  { %1012 = vmatpush.bf16.msra.mxu3 %v2572_v53 }
 0x3d4   :  { %1013 = vmatpush.bf16.msra.mxu3 %v2582_v56 }
 0x3d8   :  { %1014 = vmatpush.bf16.msra.mxu3 %v2592_v59 }
 0x3db   :  { %1965 = vmatmul.msk.bf16.vlgmr.msrb.gmra.mxu3 %vm748_vm4, %v939_v63 }
 0x3dc   :  { %1257 = vmatpush.bf16.msrb.mxu3 %v2566_v50 }
 0x3e0   :  { %1258 = vmatpush.bf16.msrb.mxu3 %v2572_v53 }
 0x3e4   :  { %1259 = vmatpush.bf16.msrb.mxu3 %v2582_v56 }
 0x3e8   :  { %1260 = vmatpush.bf16.msrb.mxu3 %v2592_v59 }
 0x44e   :  { %v893_v2 = vpop.f32.mrf.mxu3 }
 0x44f   :  { %v894_v3 = vadd.f32 %v2617_v0, %v893_v2 }
 0x451   :  { %2043 = vtanh.f32 %v894_v3  ;;  %v1964_v13 = vmul.f32 -1.442695, %v894_v3 }
 0x456   :  { %v895_v4 = vpop.f32.mrf.mxu3 }
 0x457   :  { %v2044_v5 = vpop.eup %2043 }
 0x458   :  { %919 = vrot.lane.b32.xlu2 %v2044_v5, %s2274_s26 }
 0x45e   :  { %v952_v8 = vpop.f32.mrf.mxu3 }
 0x45f   :  { %v956_v9 = vadd.f32 %v952_v8, %v773_v7 }
 0x461   :  { %2045 = vtanh.f32 %v956_v9  ;;  %v1966_v55 = vmul.f32 -1.442695, %v956_v9 }
 0x462   :  { %2047 = vpow2.f32 %v1964_v13 }
 0x466   :  { %v954_v10 = vpop.f32.mrf.mxu3 }
 0x467   :  { %v2046_v11 = vpop.eup %2045 }
 0x468   :  { %979 = vrot.lane.b32.xlu0 %v2046_v11, %s2274_s26  ;;  %v2048_v51 = vpop.eup %2047  ;;  %v776_v11 = vadd.f32 %v2531_v12, %v2537_v17 }
 0x469   :  { %v900_v14 = vadd.f32 1.0, %v2048_v51 }
 0x46b   :  { %2049 = vrcp.f32 %v900_v14  ;;  %v912_v27 = vand.u32 2147483648, %v900_v14  ;;  %vm906_vm10 = vweird.f32 %v900_v14  ;;  %v910_v28 = vand.u32 2147483647, %v900_v14 }
 0x46c   :  { %2051 = vpow2.f32 %v1966_v55 }
 0x46d   :  { %v913_v30 = vor.u32 1.1754944e-38, %v912_v27  ;;  %vm911_vm12 = vcmp.eq.f32.partialorder %v910_v28, 8.507059e+37 }
 0x471   :  { %v2050_v16 = vpop.eup %2049 }
 0x472   :  { %v902_v20 = vmul.f32 %v2050_v16, %v900_v14  ;;  %vm907_vm9 = vweird.f32 %v2050_v16  ;;  %v2052_v34 = vpop.eup %2051 }
 0x473   :  { %vm908_vm11 = vmor %vm906_vm10, %vm907_vm9  ;;  %v960_v35 = vadd.f32 1.0, %v2052_v34 }
 0x474   :  { %v903_v22 = vsub.f32 1.0, %v902_v20 }
 0x475   :  { %2053 = vrcp.f32 %v960_v35  ;;  %v972_v41 = vand.u32 2147483648, %v960_v35  ;;  %vm966_vm14 = vweird.f32 %v960_v35  ;;  %v970_v42 = vand.u32 2147483647, %v960_v35 }
 0x476   :  { %v904_v24 = vmul.f32 %v2050_v16, %v903_v22 }
 0x477   :  { %v973_v44 = vor.u32 1.1754944e-38, %v972_v41  ;;  %vm971_vm0 = vcmp.eq.f32.partialorder %v970_v42, 8.507059e+37 }
 0x478   :  { %v905_v26 = vadd.f32 %v2050_v16, %v904_v24 }
 0x47a   :  { %v909_v29 = vsel %vm908_vm11, %v2050_v16, %v905_v26 }
 0x47b   :  { %v914_v31 = vsel %vm911_vm12, %v913_v30, %v909_v29  ;;  %v2054_v36 = vpop.eup %2053 }
 0x47c   :  { %v962_v37 = vmul.f32 %v2054_v36, %v960_v35  ;;  %vm967_vm13 = vweird.f32 %v2054_v36  ;;  %v917_v48 = vmul.f32 0.0, %v914_v31 }
 0x47d   :  { %vm968_vm15 = vmor %vm966_vm14, %vm967_vm13 }
 0x47e   :  { %v963_v38 = vsub.f32 1.0, %v962_v37 }
 0x480   :  { %v964_v39 = vmul.f32 %v2054_v36, %v963_v38 }
 0x482   :  { %v965_v40 = vadd.f32 %v2054_v36, %v964_v39 }
 0x484   :  { %v969_v43 = vsel %vm968_vm15, %v2054_v36, %v965_v40 }
 0x485   :  { %v974_v45 = vsel %vm971_vm0, %v973_v44, %v969_v43 }
 0x486   :  { %v977_v1 = vmul.f32 %v974_v45, %v2551_v15 }
 0x4b2   :  { %v920_v32 = vpop.permute.xlu2 %919 }
 0x4b3   :  { %v922_v33 = vmul.f32 %v920_v32, %v914_v31 }
 0x4b5   :  { %924 = vrot.lane.b32.xlu1 %v922_v33, %s2274_s26 }
 0x4da   :  { %v980_v19 = vpop.permute.xlu0 %979 }
 0x4db   :  { %v982_v47 = vmul.f32 %v980_v19, %v974_v45 }
 0x4dd   :  { %984 = vrot.lane.b32.xlu2 %v982_v47, %s2274_s26 }
 0x527   :  { %v925_v49 = vpop.permute.xlu1 %924 }
 0x528   :  { %v2626_v52 = vadd.f32 %v925_v49, %v917_v48 }
 0x52a   :  { %2055 = vtanh.f32 %v2626_v52 }
 0x530   :  { %v2056_v54 = vpop.eup %2055 }
 0x531   :  { %930 = vrot.lane.b32.xlu0 %v2056_v54, %s2274_s26 }
 0x537   :  { %v985_v57 = vpop.permute.xlu2 %984 }
 0x538   :  { %v2631_v58 = vadd.f32 %v985_v57, %v977_v1 }
 0x53a   :  { %2057 = vtanh.f32 %v2631_v58 }
 0x540   :  { %v2058_v60 = vpop.eup %2057 }
 0x541   :  { %990 = vrot.lane.b32.xlu1 %v2058_v60, %s2274_s26 }
 0x5a3   :  { %v931_v61 = vpop.permute.xlu0 %930 }
 0x5a4   :  { %v933_v62 = vmul.f32 %v931_v61, %v914_v31 }
 0x5a6   :  { %999 = vrot.lane.b32.xlu0 %v933_v62, %s2276_s23 }
 0x5b3   :  { %v991_v63 = vpop.permute.xlu1 %990 }
 0x5b4   :  { %v993_v2 = vmul.f32 %v991_v63, %v974_v45 }
 0x5b6   :  { %v1059_v3 = vpack.c.bf16 %v993_v2, %v993_v2  ;;  %995 = vrot.lane.b32.xlu2 %v993_v2, %s2275_s27 }
 0x5b8   :  { %1061 = vrot.lane.b32.xlu1 %v1059_v3, %s2275_s27 }
 0x610   :  { %v996_v15 = vpop.permute.xlu2 %995 }
 0x618   :  { %v1000_v4 = vpop.permute.xlu0 %999 }
 0x619   :  { %v1002_v5 = vsel %vm748_vm4, %v996_v15, %v1000_v4 }
 0x61a   :  { %v1003_v7 = vpack.c.bf16 %v1002_v5, %v1002_v5 }
 0x61c   :  { %1967 = vmatmul.msk.bf16.vlgmr.msra.gmra.mxu3 %vm484_vm3, %v1003_v7 }
 0x61d   :  { %1503 = vmatpush.bf16.msra.mxu3 %v2566_v50 }
 0x621   :  { %1504 = vmatpush.bf16.msra.mxu3 %v2572_v53 }
 0x625   :  { %1505 = vmatpush.bf16.msra.mxu3 %v2582_v56 }
 0x629   :  { %1506 = vmatpush.bf16.msra.mxu3 %v2592_v59 }
 0x62a   :  { %v1062_v8 = vpop.permute.xlu1 %1061 }
 0x62b   :  { %1969 = vmatmul.msk.bf16.vlgmr.msra.gmra.mxu0 %vm748_vm4, %v1062_v8 }
 0x62c   :  { %1564 = vmatpush.bf16.msra.mxu0 %v2465_v6 }
 0x630   :  { %1565 = vmatpush.bf16.msra.mxu0 %v2488_v46 }
 0x69f   :  { %v1016_v9 = vpop.f32.mrf.mxu3 }
 0x6a0   :  { %v1017_v10 = vadd.f32 %v2617_v0, %v1016_v9 }
 0x6a2   :  { %2059 = vtanh.f32 %v1017_v10  ;;  %v1968_v55 = vmul.f32 -1.442695, %v1017_v10 }
 0x6a7   :  { %v1018_v13 = vpop.f32.mrf.mxu3 }
 0x6a8   :  { %v2060_v51 = vpop.eup %2059  ;;  %v1075_v14 = vpop.f32.mrf.mxu0 }
 0x6a9   :  { %v1079_v16 = vadd.f32 %v1075_v14, %v776_v11  ;;  %1042 = vrot.lane.b32.xlu0 %v2060_v51, %s2274_s26  ;;  %v2676_v14 = vpop.f32.mrf.mxu2 }
 0x6ab   :  { %2061 = vtanh.f32 %v1079_v16  ;;  %v1970_v24 = vmul.f32 -1.442695, %v1079_v16 }
 0x6ad   :  { %2063 = vpow2.f32 %v1970_v24 }
 0x6b0   :  { %v1077_v20 = vpop.f32.mrf.mxu0 }
 0x6b1   :  { %v2062_v22 = vpop.eup %2061 }
 0x6b2   :  { %1102 = vrot.lane.b32.xlu2 %v2062_v22, %s2274_s26 }
 0x6b3   :  { %v2064_v26 = vpop.eup %2063 }
 0x6b4   :  { %v1083_v27 = vadd.f32 1.0, %v2064_v26 }
 0x6b6   :  { %2065 = vrcp.f32 %v1083_v27  ;;  %v1095_v35 = vand.u32 2147483648, %v1083_v27  ;;  %vm1089_vm2 = vweird.f32 %v1083_v27  ;;  %v1093_v36 = vand.u32 2147483647, %v1083_v27 }
 0x6b7   :  { %2067 = vpow2.f32 %v1968_v55 }
 0x6b8   :  { %v1096_v39 = vor.u32 1.1754944e-38, %v1095_v35  ;;  %vm1094_vm6 = vcmp.eq.f32.partialorder %v1093_v36, 8.507059e+37 }
 0x6bc   :  { %v2066_v28 = vpop.eup %2065 }
 0x6bd   :  { %v2068_v17 = vpop.eup %2067  ;;  %v1085_v29 = vmul.f32 %v2066_v28, %v1083_v27  ;;  %vm1090_vm1 = vweird.f32 %v2066_v28 }
 0x6be   :  { %v1023_v30 = vadd.f32 1.0, %v2068_v17  ;;  %vm1091_vm5 = vmor %vm1089_vm2, %vm1090_vm1 }
 0x6bf   :  { %v1086_v31 = vsub.f32 1.0, %v1085_v29 }
 0x6c0   :  { %2069 = vrcp.f32 %v1023_v30  ;;  %v1035_v45 = vand.u32 2147483648, %v1023_v30  ;;  %vm1029_vm8 = vweird.f32 %v1023_v30  ;;  %v1033_v47 = vand.u32 2147483647, %v1023_v30 }
 0x6c1   :  { %v1087_v32 = vmul.f32 %v2066_v28, %v1086_v31 }
 0x6c2   :  { %v1036_v49 = vor.u32 1.1754944e-38, %v1035_v45  ;;  %vm1034_vm10 = vcmp.eq.f32.partialorder %v1033_v47, 8.507059e+37 }
 0x6c3   :  { %v1088_v34 = vadd.f32 %v2066_v28, %v1087_v32 }
 0x6c5   :  { %v1092_v38 = vsel %vm1091_vm5, %v2066_v28, %v1088_v34 }
 0x6c6   :  { %v2070_v33 = vpop.eup %2069  ;;  %v1097_v41 = vsel %vm1094_vm6, %v1096_v39, %v1092_v38 }
 0x6c7   :  { %v1025_v37 = vmul.f32 %v2070_v33, %v1023_v30  ;;  %vm1030_vm7 = vweird.f32 %v2070_v33  ;;  %v1100_v63 = vmul.f32 %v1097_v41, %v2631_v58 }
 0x6c8   :  { %vm1031_vm9 = vmor %vm1029_vm8, %vm1030_vm7 }
 0x6c9   :  { %v1026_v42 = vsub.f32 1.0, %v1025_v37 }
 0x6cb   :  { %v1027_v44 = vmul.f32 %v2070_v33, %v1026_v42 }
 0x6cd   :  { %v1028_v19 = vadd.f32 %v2070_v33, %v1027_v44 }
 0x6cf   :  { %v1032_v48 = vsel %vm1031_vm9, %v2070_v33, %v1028_v19 }
 0x6d0   :  { %v1037_v1 = vsel %vm1034_vm10, %v1036_v49, %v1032_v48 }
 0x6d1   :  { %v1040_v60 = vmul.f32 %v1037_v1, %v2626_v52 }
 0x70c   :  { %v1103_v40 = vpop.permute.xlu2 %1102 }
 0x70d   :  { %v1105_v43 = vmul.f32 %v1103_v40, %v1097_v41 }
 0x70f   :  { %1107 = vrot.lane.b32.xlu1 %v1105_v43, %s2274_s26 }
 0x71b   :  { %v1043_v54 = vpop.permute.xlu0 %1042 }
 0x71c   :  { %v1045_v57 = vmul.f32 %v1043_v54, %v1037_v1 }
 0x71e   :  { %1047 = vrot.lane.b32.xlu2 %v1045_v57, %s2274_s26 }
 0x778   :  { %v1048_v61 = vpop.permute.xlu2 %1047 }
 0x779   :  { %v2655_v62 = vadd.f32 %v1048_v61, %v1040_v60 }
 0x77b   :  { %2071 = vtanh.f32 %v2655_v62 }
 0x781   :  { %v2072_v2 = vpop.eup %2071  ;;  %v1108_v3 = vpop.permute.xlu1 %1107 }
 0x782   :  { %v2659_v15 = vadd.f32 %v1108_v3, %v1100_v63  ;;  %1053 = vrot.lane.b32.xlu1 %v2072_v2, %s2274_s26 }
 0x784   :  { %2073 = vtanh.f32 %v2659_v15 }
 0x78a   :  { %v2074_v4 = vpop.eup %2073 }
 0x78b   :  { %1113 = vrot.lane.b32.xlu0 %v2074_v4, %s2274_s26 }
 0x7f4   :  { %v1054_v5 = vpop.permute.xlu1 %1053 }
 0x7f5   :  { %v1056_v52 = vmul.f32 %v1054_v5, %v1037_v1 }
 0x7f7   :  { %1122 = vrot.lane.b32.xlu1 %v1056_v52, %s2276_s23 }
 0x7fd   :  { %v1114_v7 = vpop.permute.xlu0 %1113 }
 0x7fe   :  { %v1116_v8 = vmul.f32 %v1114_v7, %v1097_v41 }
 0x800   :  { %v1182_v9 = vpack.c.bf16 %v1116_v8, %v1116_v8  ;;  %1118 = vrot.lane.b32.xlu0 %v1116_v8, %s2275_s27 }
 0x802   :  { %1184 = vrot.lane.b32.xlu2 %v1182_v9, %s2275_s27 }
 0x85c   :  { %v1185_v58 = vpop.permute.xlu2 %1184 }
 0x85d   :  { %1973 = vmatmul.msk.bf16.vlgmr.msra.gmra.mxu2 %vm748_vm4, %v1185_v58 }
 0x85e   :  { %1687 = vmatpush.bf16.msra.mxu2 %v2465_v6  ;;  %v778_v6 = vadd.f32 %v2531_v12, %v2539_v18 }
 0x862   :  { %1688 = vmatpush.bf16.msra.mxu2 %v2488_v46 }
 0x869   :  { %v1123_v10 = vpop.permute.xlu1 %1122 }
 0x872   :  { %v1119_v11 = vpop.permute.xlu0 %1118 }
 0x873   :  { %v1125_v13 = vsel %vm748_vm4, %v1119_v11, %v1123_v10 }
 0x874   :  { %v1126_v51 = vpack.c.bf16 %v1125_v13, %v1125_v13 }
 0x876   :  { %1971 = vmatmul.msk.bf16.vlgmr.msra.gmra.mxu1 %vm484_vm3, %v1126_v51 }
 0x877   :  { %1626 = vmatpush.bf16.msra.mxu1 %v2566_v50 }
 0x87b   :  { %1627 = vmatpush.bf16.msra.mxu1 %v2572_v53 }
 0x87f   :  { %1628 = vmatpush.bf16.msra.mxu1 %v2582_v56 }
 0x883   :  { %1629 = vmatpush.bf16.msra.mxu1 %v2592_v59 }
 0x8e0   :  { %v1198_v46 = vpop.f32.mrf.mxu2 }
 0x8e1   :  { %v1202_v16 = vadd.f32 %v1198_v46, %v778_v6 }
 0x8e3   :  { %2075 = vtanh.f32 %v1202_v16  ;;  %v1974_v17 = vmul.f32 -1.442695, %v1202_v16 }
 0x8e8   :  { %v1200_v20 = vpop.f32.mrf.mxu2 }
 0x8e9   :  { %v2076_v22 = vpop.eup %2075 }
 0x8ea   :  { %1225 = vrot.lane.b32.xlu0 %v2076_v22, %s2274_s26 }
 0x8f3   :  { %v1139_v24 = vpop.f32.mrf.mxu1 }
 0x8f4   :  { %v1140_v26 = vadd.f32 %v2617_v0, %v1139_v24 }
 0x8f6   :  { %2077 = vtanh.f32 %v1140_v26  ;;  %v1972_v28 = vmul.f32 -1.442695, %v1140_v26 }
 0x8f8   :  { %2079 = vpow2.f32 %v1972_v28 }
 0x8f9   :  { %2081 = vpow2.f32 %v1974_v17 }
 0x8fb   :  { %v1141_v27 = vpop.f32.mrf.mxu1 }
 0x8fc   :  { %v2078_v55 = vpop.eup %2077 }
 0x8fd   :  { %1165 = vrot.lane.b32.xlu2 %v2078_v55, %s2274_s26 }
 0x8fe   :  { %v2080_v12 = vpop.eup %2079 }
 0x8ff   :  { %v1146_v18 = vadd.f32 1.0, %v2080_v12  ;;  %v2082_v29 = vpop.eup %2081 }
 0x900   :  { %v1206_v30 = vadd.f32 1.0, %v2082_v29 }
 0x901   :  { %2083 = vrcp.f32 %v1146_v18  ;;  %v1158_v39 = vand.u32 2147483648, %v1146_v18  ;;  %vm1152_vm12 = vweird.f32 %v1146_v18  ;;  %v1156_v41 = vand.u32 2147483647, %v1146_v18 }
 0x902   :  { %2085 = vrcp.f32 %v1206_v30  ;;  %v1218_v19 = vand.u32 2147483648, %v1206_v30  ;;  %vm1212_vm0 = vweird.f32 %v1206_v30  ;;  %v1216_v48 = vand.u32 2147483647, %v1206_v30 }
 0x903   :  { %v1159_v43 = vor.u32 1.1754944e-38, %v1158_v39  ;;  %vm1157_vm15 = vcmp.eq.f32.partialorder %v1156_v41, 8.507059e+37 }
 0x904   :  { %v1219_v1 = vor.u32 1.1754944e-38, %v1218_v19  ;;  %vm1217_vm2 = vcmp.eq.f32.partialorder %v1216_v48, 8.507059e+37 }
 0x907   :  { %v2084_v31 = vpop.eup %2083 }
 0x908   :  { %v1148_v32 = vmul.f32 %v2084_v31, %v1146_v18  ;;  %v2086_v33 = vpop.eup %2085  ;;  %vm1153_vm11 = vweird.f32 %v2084_v31 }
 0x909   :  { %v1208_v35 = vmul.f32 %v2086_v33, %v1206_v30  ;;  %vm1154_vm13 = vmor %vm1152_vm12, %vm1153_vm11  ;;  %vm1213_vm14 = vweird.f32 %v2086_v33 }
 0x90a   :  { %v1149_v34 = vsub.f32 1.0, %v1148_v32  ;;  %vm1214_vm1 = vmor %vm1212_vm0, %vm1213_vm14 }
 0x90b   :  { %v1209_v37 = vsub.f32 1.0, %v1208_v35 }
 0x90c   :  { %v1150_v36 = vmul.f32 %v2084_v31, %v1149_v34 }
 0x90d   :  { %v1210_v40 = vmul.f32 %v2086_v33, %v1209_v37 }
 0x90e   :  { %v1151_v38 = vadd.f32 %v2084_v31, %v1150_v36 }
 0x90f   :  { %v1211_v44 = vadd.f32 %v2086_v33, %v1210_v40 }
 0x910   :  { %v1155_v42 = vsel %vm1154_vm13, %v2084_v31, %v1151_v38 }
 0x911   :  { %v1160_v45 = vsel %vm1157_vm15, %v1159_v43, %v1155_v42  ;;  %v1215_v54 = vsel %vm1214_vm1, %v2086_v33, %v1211_v44 }
 0x912   :  { %v1220_v60 = vsel %vm1217_vm2, %v1219_v1, %v1215_v54  ;;  %v1163_v5 = vmul.f32 %v1160_v45, %v2655_v62 }
 0x913   :  { %v1223_v63 = vmul.f32 %v1220_v60, %v2659_v15 }
 0x957   :  { %v1166_v47 = vpop.permute.xlu2 %1165 }
 0x958   :  { %v1168_v49 = vmul.f32 %v1166_v47, %v1160_v45 }
 0x95a   :  { %1170 = vrot.lane.b32.xlu1 %v1168_v49, %s2274_s26 }
 0x95c   :  { %v1226_v57 = vpop.permute.xlu0 %1225 }
 0x95d   :  { %v1228_v61 = vmul.f32 %v1226_v57, %v1220_v60 }
 0x95f   :  { %1230 = vrot.lane.b32.xlu2 %v1228_v61, %s2274_s26 }
 0x9b9   :  { %v1231_v2 = vpop.permute.xlu2 %1230 }
 0x9ba   :  { %v2686_v3 = vadd.f32 %v1231_v2, %v1223_v63 }
 0x9bc   :  { %2087 = vtanh.f32 %v2686_v3 }
 0x9c2   :  { %v2088_v4 = vpop.eup %2087 }
 0x9c3   :  { %1236 = vrot.lane.b32.xlu1 %v2088_v4, %s2274_s26 }
 0x9cc   :  { %v1171_v52 = vpop.permute.xlu1 %1170 }
 0x9cd   :  { %v2691_v7 = vadd.f32 %v1171_v52, %v1163_v5 }
 0x9cf   :  { %2089 = vtanh.f32 %v2691_v7 }
 0x9d5   :  { %v2090_v8 = vpop.eup %2089 }
 0x9d6   :  { %1176 = vrot.lane.b32.xlu0 %v2090_v8, %s2274_s26 }
 0xa35   :  { %v1237_v9 = vpop.permute.xlu1 %1236 }
 0xa36   :  { %v1239_v15 = vmul.f32 %v1237_v9, %v1220_v60 }
 0xa38   :  { %v1305_v58 = vpack.c.bf16 %v1239_v15, %v1239_v15  ;;  %1241 = vrot.lane.b32.xlu2 %v1239_v15, %s2275_s27 }
 0xa3a   :  { %1307 = vrot.lane.b32.xlu1 %v1305_v58, %s2275_s27 }
 0xa48   :  { %v1177_v10 = vpop.permute.xlu0 %1176 }
 0xa49   :  { %v1179_v11 = vmul.f32 %v1177_v10, %v1160_v45 }
 0xa4b   :  { %1245 = vrot.lane.b32.xlu0 %v1179_v11, %s2276_s23 }
 0xa92   :  { %v1242_v13 = vpop.permute.xlu2 %1241 }
 0xaac   :  { %v1308_v62 = vpop.permute.xlu1 %1307 }
 0xaad   :  { %1977 = vmatmul.msk.bf16.vlgmr.msrb.gmra.mxu0 %vm748_vm4, %v1308_v62 }
 0xabd   :  { %v1246_v51 = vpop.permute.xlu0 %1245 }
 0xabe   :  { %v1248_v6 = vsel %vm748_vm4, %v1242_v13, %v1246_v51 }
 0xabf   :  { %v1249_v46 = vpack.c.bf16 %v1248_v6, %v1248_v6 }
 0xac1   :  { %1975 = vmatmul.msk.bf16.vlgmr.msrb.gmra.mxu3 %vm484_vm3, %v1249_v46 }
 0xac2   :  { %1749 = vmatpush.bf16.msrb.mxu3 %v2566_v50 }
 0xac6   :  { %1750 = vmatpush.bf16.msrb.mxu3 %v2572_v53 }
 0xaca   :  { %1751 = vmatpush.bf16.msrb.mxu3 %v2582_v56 }
 0xace   :  { %1752 = vmatpush.bf16.msrb.mxu3 %v2592_v59 }
 0xb2a   :  { %v1321_v16 = vpop.f32.mrf.mxu0 }
 0xb2b   :  { %v1325_v20 = vadd.f32 %v1321_v16, %v2542_v21 }
 0xb2d   :  { %2091 = vtanh.f32 %v1325_v20  ;;  %v1978_v53 = vmul.f32 -1.442695, %v1325_v20 }
 0xb32   :  { %v1323_v22 = vpop.f32.mrf.mxu0 }
 0xb33   :  { %v2092_v24 = vpop.eup %2091 }
 0xb34   :  { %1348 = vrot.lane.b32.xlu2 %v2092_v24, %s2274_s26 }
 0xb44   :  { %v1262_v26 = vpop.f32.mrf.mxu3 }
 0xb45   :  { %v1263_v27 = vadd.f32 %v2617_v0, %v1262_v26 }
 0xb47   :  { %2093 = vtanh.f32 %v1263_v27  ;;  %v1976_v36 = vmul.f32 -1.442695, %v1263_v27 }
 0xb48   :  { %2095 = vpow2.f32 %v1978_v53 }
 0xb4c   :  { %v1264_v55 = vpop.f32.mrf.mxu3 }
 0xb4d   :  { %v2094_v50 = vpop.eup %2093 }
 0xb4e   :  { %1288 = vrot.lane.b32.xlu0 %v2094_v50, %s2274_s26  ;;  %v2096_v56 = vpop.eup %2095 }
 0xb4f   :  { %v1329_v59 = vadd.f32 1.0, %v2096_v56 }
 0xb51   :  { %2097 = vrcp.f32 %v1329_v59  ;;  %v1341_v29 = vand.u32 2147483648, %v1329_v59  ;;  %vm1335_vm6 = vweird.f32 %v1329_v59  ;;  %v1339_v30 = vand.u32 2147483647, %v1329_v59 }
 0xb52   :  { %2099 = vpow2.f32 %v1976_v36 }
 0xb53   :  { %v1342_v32 = vor.u32 1.1754944e-38, %v1341_v29  ;;  %vm1340_vm8 = vcmp.eq.f32.partialorder %v1339_v30, 8.507059e+37 }
 0xb57   :  { %v2098_v28 = vpop.eup %2097 }
 0xb58   :  { %v1331_v21 = vmul.f32 %v2098_v28, %v1329_v59  ;;  %vm1336_vm5 = vweird.f32 %v2098_v28  ;;  %v2100_v37 = vpop.eup %2099 }
 0xb59   :  { %vm1337_vm7 = vmor %vm1335_vm6, %vm1336_vm5  ;;  %v1269_v38 = vadd.f32 1.0, %v2100_v37 }
 0xb5a   :  { %v1332_v17 = vsub.f32 1.0, %v1331_v21 }
 0xb5b   :  { %2101 = vrcp.f32 %v1269_v38  ;;  %v1281_v44 = vand.u32 2147483648, %v1269_v38  ;;  %vm1275_vm10 = vweird.f32 %v1269_v38  ;;  %v1279_v19 = vand.u32 2147483647, %v1269_v38 }
 0xb5c   :  { %v1333_v12 = vmul.f32 %v2098_v28, %v1332_v17 }
 0xb5d   :  { %v1282_v47 = vor.u32 1.1754944e-38, %v1281_v44  ;;  %vm1280_vm12 = vcmp.eq.f32.partialorder %v1279_v19, 8.507059e+37 }
 0xb5e   :  { %v1334_v18 = vadd.f32 %v2098_v28, %v1333_v12 }
 0xb60   :  { %v1338_v31 = vsel %vm1337_vm7, %v2098_v28, %v1334_v18 }
 0xb61   :  { %v1343_v34 = vsel %vm1340_vm8, %v1342_v32, %v1338_v31  ;;  %v2102_v39 = vpop.eup %2101 }
 0xb62   :  { %v1271_v40 = vmul.f32 %v2102_v39, %v1269_v38  ;;  %vm1276_vm9 = vweird.f32 %v2102_v39  ;;  %v1346_v1 = vmul.f32 %v1343_v34, %v2686_v3 }
 0xb63   :  { %vm1277_vm11 = vmor %vm1275_vm10, %vm1276_vm9 }
 0xb64   :  { %v1272_v41 = vsub.f32 1.0, %v1271_v40 }
 0xb66   :  { %v1273_v42 = vmul.f32 %v2102_v39, %v1272_v41 }
 0xb68   :  { %v1274_v43 = vadd.f32 %v2102_v39, %v1273_v42 }
 0xb6a   :  { %v1278_v45 = vsel %vm1277_vm11, %v2102_v39, %v1274_v43 }
 0xb6b   :  { %v1283_v49 = vsel %vm1280_vm12, %v1282_v47, %v1278_v45 }
 0xb6c   :  { %v1286_v63 = vmul.f32 %v1283_v49, %v2691_v7 }
 0xb8e   :  { %v1349_v33 = vpop.permute.xlu2 %1348 }
 0xb8f   :  { %v1351_v35 = vmul.f32 %v1349_v33, %v1343_v34 }
 0xb91   :  { %1353 = vrot.lane.b32.xlu1 %v1351_v35, %s2274_s26 }
 0xbc0   :  { %v1289_v48 = vpop.permute.xlu0 %1288 }
 0xbc1   :  { %v1291_v54 = vmul.f32 %v1289_v48, %v1283_v49 }
 0xbc3   :  { %1293 = vrot.lane.b32.xlu2 %v1291_v54, %s2274_s26 }
 0xc03   :  { %v1354_v57 = vpop.permute.xlu1 %1353 }
 0xc04   :  { %v2712_v60 = vadd.f32 %v1354_v57, %v1346_v1 }
 0xc06   :  { %2103 = vtanh.f32 %v2712_v60 }
 0xc0c   :  { %v2104_v61 = vpop.eup %2103 }
 0xc0d   :  { %1359 = vrot.lane.b32.xlu0 %v2104_v61, %s2274_s26 }
 0xc1d   :  { %v1294_v2 = vpop.permute.xlu2 %1293 }
 0xc1e   :  { %v2717_v4 = vadd.f32 %v1294_v2, %v1286_v63 }
 0xc20   :  { %2105 = vtanh.f32 %v2717_v4 }
 0xc26   :  { %v2106_v5 = vpop.eup %2105 }
 0xc27   :  { %1299 = vrot.lane.b32.xlu1 %v2106_v5, %s2274_s26 }
 0xc7f   :  { %v1360_v52 = vpop.permute.xlu0 %1359 }
 0xc80   :  { %v1362_v3 = vmul.f32 %v1360_v52, %v1343_v34 }
 0xc82   :  { %v1428_v8 = vpack.c.bf16 %v1362_v3, %v1362_v3  ;;  %1364 = vrot.lane.b32.xlu0 %v1362_v3, %s2275_s27 }
 0xc84   :  { %1430 = vrot.lane.b32.xlu2 %v1428_v8, %s2275_s27 }
 0xc99   :  { %v1300_v9 = vpop.permute.xlu1 %1299 }
 0xc9a   :  { %v1302_v15 = vmul.f32 %v1300_v9, %v1283_v49 }
 0xc9c   :  { %1368 = vrot.lane.b32.xlu1 %v1302_v15, %s2276_s23 }
 0xcde   :  { %v1431_v7 = vpop.permute.xlu2 %1430 }
 0xcdf   :  { %1981 = vmatmul.msk.bf16.vlgmr.msrb.gmra.mxu2 %vm748_vm4, %v1431_v7 }
 0xcf4   :  { %v1365_v58 = vpop.permute.xlu0 %1364 }
 0xd0e   :  { %v1369_v10 = vpop.permute.xlu1 %1368 }
 0xd0f   :  { %v1371_v11 = vsel %vm748_vm4, %v1365_v58, %v1369_v10 }
 0xd10   :  { %v1372_v62 = vpack.c.bf16 %v1371_v11, %v1371_v11 }
 0xd12   :  { %1979 = vmatmul.msk.bf16.vlgmr.msrb.gmra.mxu1 %vm484_vm3, %v1372_v62 }
 0xd62   :  { %v1444_v13 = vpop.f32.mrf.mxu2 }
 0xd63   :  { %v1448_v51 = vadd.f32 %v1444_v13, %v2545_v23 }
 0xd65   :  { %2107 = vtanh.f32 %v1448_v51  ;;  %v1982_v26 = vmul.f32 -1.442695, %v1448_v51 }
 0xd6a   :  { %v1446_v6 = vpop.f32.mrf.mxu2 }
 0xd6b   :  { %v2108_v46 = vpop.eup %2107 }
 0xd6c   :  { %1471 = vrot.lane.b32.xlu0 %v2108_v46, %s2274_s26 }
 0xd8f   :  { %v1385_v16 = vpop.f32.mrf.mxu1 }
 0xd90   :  { %v1386_v20 = vadd.f32 %v2617_v0, %v1385_v16 }
 0xd92   :  { %2109 = vtanh.f32 %v1386_v20  ;;  %v1980_v50 = vmul.f32 -1.442695, %v1386_v20 }
 0xd93   :  { %2111 = vpow2.f32 %v1982_v26 }
 0xd97   :  { %v1387_v22 = vpop.f32.mrf.mxu1 }
 0xd98   :  { %v2110_v24 = vpop.eup %2109 }
 0xd99   :  { %1411 = vrot.lane.b32.xlu2 %v2110_v24, %s2274_s26  ;;  %v2112_v27 = vpop.eup %2111 }
 0xd9a   :  { %v1452_v55 = vadd.f32 1.0, %v2112_v27 }
 0xd9c   :  { %2113 = vrcp.f32 %v1452_v55  ;;  %v1464_v12 = vand.u32 2147483648, %v1452_v55  ;;  %vm1458_vm14 = vweird.f32 %v1452_v55  ;;  %v1462_v18 = vand.u32 2147483647, %v1452_v55 }
 0xd9d   :  { %2115 = vpow2.f32 %v1980_v50 }
 0xd9e   :  { %v1465_v30 = vor.u32 1.1754944e-38, %v1464_v12  ;;  %vm1463_vm0 = vcmp.eq.f32.partialorder %v1462_v18, 8.507059e+37 }
 0xda2   :  { %v2114_v23 = vpop.eup %2113 }
 0xda3   :  { %v1454_v53 = vmul.f32 %v2114_v23, %v1452_v55  ;;  %v2116_v59 = vpop.eup %2115  ;;  %vm1459_vm13 = vweird.f32 %v2114_v23 }
 0xda4   :  { %v1392_v28 = vadd.f32 1.0, %v2116_v59  ;;  %vm1460_vm15 = vmor %vm1458_vm14, %vm1459_vm13 }
 0xda5   :  { %v1455_v56 = vsub.f32 1.0, %v1454_v53 }
 0xda6   :  { %2117 = vrcp.f32 %v1392_v28  ;;  %v1404_v39 = vand.u32 2147483648, %v1392_v28  ;;  %vm1398_vm2 = vweird.f32 %v1392_v28  ;;  %v1402_v40 = vand.u32 2147483647, %v1392_v28 }
 0xda7   :  { %v1456_v21 = vmul.f32 %v2114_v23, %v1455_v56 }
 0xda8   :  { %v1405_v42 = vor.u32 1.1754944e-38, %v1404_v39  ;;  %vm1403_vm6 = vcmp.eq.f32.partialorder %v1402_v40, 8.507059e+37 }
 0xda9   :  { %v1457_v17 = vadd.f32 %v2114_v23, %v1456_v21 }
 0xdab   :  { %v1461_v29 = vsel %vm1460_vm15, %v2114_v23, %v1457_v17 }
 0xdac   :  { %v2118_v31 = vpop.eup %2117  ;;  %v1466_v33 = vsel %vm1463_vm0, %v1465_v30, %v1461_v29 }
 0xdad   :  { %v1394_v35 = vmul.f32 %v2118_v31, %v1392_v28  ;;  %vm1399_vm1 = vweird.f32 %v2118_v31  ;;  %v1469_v45 = vmul.f32 %v1466_v33, %v2712_v60 }
 0xdae   :  { %vm1400_vm5 = vmor %vm1398_vm2, %vm1399_vm1 }
 0xdaf   :  { %v1395_v36 = vsub.f32 1.0, %v1394_v35 }
 0xdb1   :  { %v1396_v37 = vmul.f32 %v2118_v31, %v1395_v36 }
 0xdb3   :  { %v1397_v38 = vadd.f32 %v2118_v31, %v1396_v37 }
 0xdb5   :  { %v1401_v41 = vsel %vm1400_vm5, %v2118_v31, %v1397_v38 }
 0xdb6   :  { %v1406_v43 = vsel %vm1403_vm6, %v1405_v42, %v1401_v41 }
 0xdb7   :  { %v1409_v54 = vmul.f32 %v1406_v43, %v2717_v4 }
 0xdde   :  { %v1472_v32 = vpop.permute.xlu0 %1471 }
 0xddf   :  { %v1474_v34 = vmul.f32 %v1472_v32, %v1466_v33 }
 0xde1   :  { %1476 = vrot.lane.b32.xlu2 %v1474_v34, %s2274_s26 }
 0xdf3   :  { %v1412_v44 = vpop.permute.xlu2 %1411 }
 0xdf4   :  { %v1414_v19 = vmul.f32 %v1412_v44, %v1406_v43 }
 0xdf6   :  { %1416 = vrot.lane.b32.xlu1 %v1414_v19, %s2274_s26 }
 0xe3b   :  { %v1477_v47 = vpop.permute.xlu2 %1476 }
 0xe3c   :  { %v2734_v48 = vadd.f32 %v1477_v47, %v1469_v45 }
 0xe3e   :  { %2119 = vtanh.f32 %v2734_v48 }
 0xe44   :  { %v2120_v49 = vpop.eup %2119 }
 0xe45   :  { %1482 = vrot.lane.b32.xlu1 %v2120_v49, %s2274_s26 }
 0xe68   :  { %v1417_v1 = vpop.permute.xlu1 %1416 }
 0xe69   :  { %v2739_v57 = vadd.f32 %v1417_v1, %v1409_v54 }
 0xe6b   :  { %2121 = vtanh.f32 %v2739_v57 }
 0xe71   :  { %v2122_v61 = vpop.eup %2121 }
 0xe72   :  { %1422 = vrot.lane.b32.xlu0 %v2122_v61, %s2274_s26 }
 0xeb7   :  { %v1483_v63 = vpop.permute.xlu1 %1482 }
 0xeb8   :  { %v1485_v60 = vmul.f32 %v1483_v63, %v1466_v33 }
 0xeba   :  { %v1551_v2 = vpack.c.bf16 %v1485_v60, %v1485_v60  ;;  %1487 = vrot.lane.b32.xlu2 %v1485_v60, %s2275_s27 }
 0xebc   :  { %1553 = vrot.lane.b32.xlu1 %v1551_v2, %s2275_s27 }
 0xee4   :  { %v1423_v5 = vpop.permute.xlu0 %1422 }
 0xee5   :  { %v1425_v52 = vmul.f32 %v1423_v5, %v1406_v43  ;;  %v2163_v5 = vld [vmem:[%s2811_s9] ss:$0 sm:$0xff] }
 0xee7   :  { %1491 = vrot.lane.b32.xlu0 %v1425_v52, %s2276_s23  ;;  %v788_v52 = vadd.f32 %v2163_v5, %v2676_v14 }
 0xf14   :  { %v1488_v3 = vpop.permute.xlu2 %1487 }
 0xf2e   :  { %v1554_v4 = vpop.permute.xlu1 %1553 }
 0xf2f   :  { %1985 = vmatmul.msk.bf16.vlgmr.msra.gmra.mxu0 %vm748_vm4, %v1554_v4 }
 0xf59   :  { %v1492_v8 = vpop.permute.xlu0 %1491 }
 0xf5a   :  { %v1494_v9 = vsel %vm748_vm4, %v1488_v3, %v1492_v8 }
 0xf5b   :  { %v1495_v15 = vpack.c.bf16 %v1494_v9, %v1494_v9 }
 0xf5d   :  { %1983 = vmatmul.msk.bf16.vlgmr.msra.gmra.mxu3 %vm484_vm3, %v1495_v15 }
 0xfac   :  { %v1567_v7 = vpop.f32.mrf.mxu0 }
 0xfad   :  { %v1571_v58 = vadd.f32 %v1567_v7, %v2548_v25  ;;  %v2779_v7 = vld [vmem:[%s2813_s11] ss:$0 sm:$0xff] }
 0xfaf   :  { %2123 = vtanh.f32 %v1571_v58  ;;  %v1986_v51 = vmul.f32 -1.442695, %v1571_v58 }
 0xfb4   :  { %v1569_v10 = vpop.f32.mrf.mxu0 }
 0xfb5   :  { %v2124_v11 = vpop.eup %2123 }
 0xfb6   :  { %1594 = vrot.lane.b32.xlu2 %v2124_v11, %s2274_s26 }
 0xfe0   :  { %v1508_v62 = vpop.f32.mrf.mxu3 }
 0xfe1   :  { %v1509_v13 = vadd.f32 %v2617_v0, %v1508_v62 }
 0xfe3   :  { %2125 = vtanh.f32 %v1509_v13  ;;  %v1984_v28 = vmul.f32 -1.442695, %v1509_v13 }
 0xfe4   :  { %2127 = vpow2.f32 %v1986_v51 }
 0xfe8   :  { %v1510_v6 = vpop.f32.mrf.mxu3 }
 0xfe9   :  { %v2126_v46 = vpop.eup %2125 }
 0xfea   :  { %1534 = vrot.lane.b32.xlu0 %v2126_v46, %s2274_s26  ;;  %v2128_v16 = vpop.eup %2127 }
 0xfeb   :  { %v1575_v20 = vadd.f32 1.0, %v2128_v16 }
 0xfed   :  { %2129 = vrcp.f32 %v1575_v20  ;;  %v1587_v55 = vand.u32 2147483648, %v1575_v20  ;;  %vm1581_vm8 = vweird.f32 %v1575_v20  ;;  %v1585_v50 = vand.u32 2147483647, %v1575_v20 }
 0xfee   :  { %2131 = vpow2.f32 %v1984_v28 }
 0xfef   :  { %v1588_v23 = vor.u32 1.1754944e-38, %v1587_v55  ;;  %vm1586_vm10 = vcmp.eq.f32.partialorder %v1585_v50, 8.507059e+37 }
 0xff3   :  { %v2130_v22 = vpop.eup %2129 }
 0xff4   :  { %v1577_v25 = vmul.f32 %v2130_v22, %v1575_v20  ;;  %vm1582_vm7 = vweird.f32 %v2130_v22  ;;  %v2132_v21 = vpop.eup %2131 }
 0xff5   :  { %vm1583_vm9 = vmor %vm1581_vm8, %vm1582_vm7  ;;  %v1515_v17 = vadd.f32 1.0, %v2132_v21 }
 0xff6   :  { %v1578_v24 = vsub.f32 1.0, %v1577_v25 }
 0xff7   :  { %2133 = vrcp.f32 %v1515_v17  ;;  %v1527_v32 = vand.u32 2147483648, %v1515_v17  ;;  %vm1521_vm12 = vweird.f32 %v1515_v17  ;;  %v1525_v33 = vand.u32 2147483647, %v1515_v17 }
 0xff8   :  { %v1579_v26 = vmul.f32 %v2130_v22, %v1578_v24 }
 0xff9   :  { %v1528_v35 = vor.u32 1.1754944e-38, %v1527_v32  ;;  %vm1526_vm14 = vcmp.eq.f32.partialorder %v1525_v33, 8.507059e+37 }
 0xffa   :  { %v1580_v27 = vadd.f32 %v2130_v22, %v1579_v26 }
 0xffc   :  { %v1584_v0 = vsel %vm1583_vm9, %v2130_v22, %v1580_v27 }
 0xffd   :  { %v1589_v56 = vsel %vm1586_vm10, %v1588_v23, %v1584_v0  ;;  %v2134_v12 = vpop.eup %2133 }
 0xffe   :  { %v1517_v18 = vmul.f32 %v2134_v12, %v1515_v17  ;;  %vm1522_vm11 = vweird.f32 %v2134_v12  ;;  %v1592_v39 = vmul.f32 %v1589_v56, %v2734_v48 }
 0xfff   :  { %vm1523_vm13 = vmor %vm1521_vm12, %vm1522_vm11  ;;  %vm1825_vm12 = vcmask 7168  }
0x1000   :  { %v1518_v29 = vsub.f32 1.0, %v1517_v18 }
0x1002   :  { %v1519_v30 = vmul.f32 %v2134_v12, %v1518_v29 }
0x1004   :  { %v1520_v31 = vadd.f32 %v2134_v12, %v1519_v30 }
0x1006   :  { %v1524_v34 = vsel %vm1523_vm13, %v2134_v12, %v1520_v31 }
0x1007   :  { %v1529_v37 = vsel %vm1526_vm14, %v1528_v35, %v1524_v34 }
0x1008   :  { %v1532_v43 = vmul.f32 %v1529_v37, %v2739_v57 }
0x1010   :  { %v1595_v53 = vpop.permute.xlu2 %1594 }
0x1011   :  { %v1597_v59 = vmul.f32 %v1595_v53, %v1589_v56 }
0x1013   :  { %1599 = vrot.lane.b32.xlu1 %v1597_v59, %s2274_s26 }
0x105c   :  { %v1535_v36 = vpop.permute.xlu0 %1534 }
0x105d   :  { %v1537_v38 = vmul.f32 %v1535_v36, %v1529_v37 }
0x105f   :  { %1539 = vrot.lane.b32.xlu2 %v1537_v38, %s2274_s26 }
0x1085   :  { %v1600_v40 = vpop.permute.xlu1 %1599 }
0x1086   :  { %v2756_v41 = vadd.f32 %v1600_v40, %v1592_v39 }
0x1088   :  { %2135 = vtanh.f32 %v2756_v41 }
0x108e   :  { %v2136_v42 = vpop.eup %2135 }
0x108f   :  { %1605 = vrot.lane.b32.xlu0 %v2136_v42, %s2274_s26 }
0x10b9   :  { %v1540_v44 = vpop.permute.xlu2 %1539 }
0x10ba   :  { %v2761_v19 = vadd.f32 %v1540_v44, %v1532_v43 }
0x10bc   :  { %2137 = vtanh.f32 %v2761_v19 }
0x10c2   :  { %v2138_v45 = vpop.eup %2137 }
0x10c3   :  { %1545 = vrot.lane.b32.xlu1 %v2138_v45, %s2274_s26 }
0x1101   :  { %v1606_v47 = vpop.permute.xlu0 %1605 }
0x1102   :  { %v1608_v48 = vmul.f32 %v1606_v47, %v1589_v56 }
0x1104   :  { %v1674_v49 = vpack.c.bf16 %v1608_v48, %v1608_v48  ;;  %1610 = vrot.lane.b32.xlu0 %v1608_v48, %s2275_s27 }
0x1106   :  { %1676 = vrot.lane.b32.xlu2 %v1674_v49, %s2275_s27 }
0x1135   :  { %v1546_v54 = vpop.permute.xlu1 %1545 }
0x1136   :  { %v1548_v1 = vmul.f32 %v1546_v54, %v1529_v37 }
0x1138   :  { %1614 = vrot.lane.b32.xlu1 %v1548_v1, %s2276_s23 }
0x1160   :  { %v1677_v57 = vpop.permute.xlu2 %1676 }
0x1161   :  { %1989 = vmatmul.msk.bf16.vlgmr.msra.gmra.mxu2 %vm748_vm4, %v1677_v57 }
0x1176   :  { %v1611_v61 = vpop.permute.xlu0 %1610 }
0x11aa   :  { %v1615_v63 = vpop.permute.xlu1 %1614 }
0x11ab   :  { %v1617_v60 = vsel %vm748_vm4, %v1611_v61, %v1615_v63 }
0x11ac   :  { %v1618_v2 = vpack.c.bf16 %v1617_v60, %v1617_v60 }
0x11ae   :  { %1987 = vmatmul.msk.bf16.vlgmr.msra.gmra.mxu1 %vm484_vm3, %v1618_v2 }
0x11e4   :  { %v1690_v4 = vpop.f32.mrf.mxu2 }
0x11e5   :  { %v1694_v3 = vadd.f32 %v1690_v4, %v788_v52 }
0x11e7   :  { %2139 = vtanh.f32 %v1694_v3  ;;  %v1990_v10 = vmul.f32 -1.442695, %v1694_v3 }
0x11ec   :  { %v1692_v8 = vpop.f32.mrf.mxu2 }
0x11ed   :  { %v2140_v9 = vpop.eup %2139 }
0x11ee   :  { %1717 = vrot.lane.b32.xlu0 %v2140_v9, %s2274_s26 }
0x122b   :  { %v1631_v15 = vpop.f32.mrf.mxu1 }
0x122c   :  { %v1632_v58 = vadd.f32 %v2779_v7, %v1631_v15 }
0x122e   :  { %2141 = vtanh.f32 %v1632_v58  ;;  %v1988_v0 = vmul.f32 -1.442695, %v1632_v58 }
0x122f   :  { %2143 = vpow2.f32 %v1990_v10 }
0x1233   :  { %v1633_v11 = vpop.f32.mrf.mxu1 }
0x1234   :  { %v2142_v62 = vpop.eup %2141 }
0x1235   :  { %1657 = vrot.lane.b32.xlu2 %v2142_v62, %s2274_s26  ;;  %v2144_v14 = vpop.eup %2143 }
0x1236   :  { %v1698_v13 = vadd.f32 1.0, %v2144_v14 }
0x1238   :  { %2145 = vrcp.f32 %v1698_v13  ;;  %v1710_v22 = vand.u32 2147483648, %v1698_v13  ;;  %vm1704_vm0 = vweird.f32 %v1698_v13  ;;  %v1708_v25 = vand.u32 2147483647, %v1698_v13 }
0x1239   :  { %2147 = vpow2.f32 %v1988_v0  ;;  %v2034_v0 = vld [vmem:[#allocation5] ss:$0 sm:$0xff] }
0x123a   :  { %v1711_v26 = vor.u32 1.1754944e-38, %v1710_v22  ;;  %vm1709_vm2 = vcmp.eq.f32.partialorder %v1708_v25, 8.507059e+37  ;;  %v1797_v25 = vld [vmem:[#allocation11 + $0x8] sm:$0xff] }
0x123e   :  { %v2146_v51 = vpop.eup %2145 }
0x123f   :  { %v1700_v6 = vmul.f32 %v2146_v51, %v1698_v13  ;;  %vm1705_vm15 = vweird.f32 %v2146_v51  ;;  %v2148_v23 = vpop.eup %2147 }
0x1240   :  { %vm1706_vm1 = vmor %vm1704_vm0, %vm1705_vm15  ;;  %v1638_v53 = vadd.f32 1.0, %v2148_v23 }
0x1241   :  { %v1701_v46 = vsub.f32 1.0, %v1700_v6 }
0x1242   :  { %2149 = vrcp.f32 %v1638_v53  ;;  %v1650_v12 = vand.u32 2147483648, %v1638_v53  ;;  %vm1644_vm6 = vweird.f32 %v1638_v53  ;;  %v1648_v18 = vand.u32 2147483647, %v1638_v53 }
0x1243   :  { %v1702_v16 = vmul.f32 %v2146_v51, %v1701_v46  ;;  %v1798_v46 = vld [vmem:[#allocation11 + $0x10] sm:$0xff] }
0x1244   :  { %v1651_v30 = vor.u32 1.1754944e-38, %v1650_v12  ;;  %vm1649_vm8 = vcmp.eq.f32.partialorder %v1648_v18, 8.507059e+37 }
0x1245   :  { %v1703_v20 = vadd.f32 %v2146_v51, %v1702_v16  ;;  %v1799_v16 = vld [vmem:[#allocation11 + $0x18] sm:$0xff] }
0x1246   :  { %v1801_v22 = vpack.c.bf16 %v1799_v16, %v1798_v46 }
0x1247   :  { %v1707_v24 = vsel %vm1706_vm1, %v2146_v51, %v1703_v20  ;;  %v1796_v20 = vld [vmem:[#allocation11] sm:$0xff] }
0x1248   :  { %v1712_v55 = vsel %vm1709_vm2, %v1711_v26, %v1707_v24  ;;  %v2150_v56 = vpop.eup %2149  ;;  %1818 = vmatpush.bf16.msrb.mxu0 %v1801_v22  ;;  %v1800_v24 = vpack.c.bf16 %v1797_v25, %v1796_v20 }
0x1249   :  { %v1640_v59 = vmul.f32 %v2150_v56, %v1638_v53  ;;  %vm1645_vm5 = vweird.f32 %v2150_v56  ;;  %v1715_v34 = vmul.f32 %v1712_v55, %v2756_v41 }
0x124a   :  { %vm1646_vm7 = vmor %vm1644_vm6, %vm1645_vm5 }
0x124b   :  { %v1641_v28 = vsub.f32 1.0, %v1640_v59 }
0x124c   :  { %1819 = vmatpush.bf16.msrb.mxu0 %v1800_v24 }
0x124d   :  { %v1642_v21 = vmul.f32 %v2150_v56, %v1641_v28 }
0x124f   :  { %v1643_v17 = vadd.f32 %v2150_v56, %v1642_v21 }
0x1251   :  { %v1647_v29 = vsel %vm1646_vm7, %v2150_v56, %v1643_v17 }
0x1252   :  { %v1652_v31 = vsel %vm1649_vm8, %v1651_v30, %v1647_v29 }
0x1253   :  { %v1655_v38 = vmul.f32 %v1652_v31, %v2761_v19 }
0x1260   :  { %v1718_v27 = vpop.permute.xlu0 %1717 }
0x1261   :  { %v1720_v50 = vmul.f32 %v1718_v27, %v1712_v55 }
0x1263   :  { %1722 = vrot.lane.b32.xlu2 %v1720_v50, %s2274_s26 }
0x128f   :  { %v1658_v32 = vpop.permute.xlu2 %1657 }
0x1290   :  { %v1660_v33 = vmul.f32 %v1658_v32, %v1652_v31 }
0x1292   :  { %1662 = vrot.lane.b32.xlu1 %v1660_v33, %s2274_s26 }
0x12bd   :  { %v1723_v35 = vpop.permute.xlu2 %1722 }
0x12be   :  { %v1725_v36 = vadd.f32 %v1723_v35, %v1715_v34 }
0x12c0   :  { %2151 = vtanh.f32 %v1725_v36 }
0x12c6   :  { %v2152_v37 = vpop.eup %2151 }
0x12c7   :  { %1728 = vrot.lane.b32.xlu1 %v2152_v37, %s2274_s26 }
0x1304   :  { %v1663_v39 = vpop.permute.xlu1 %1662 }
0x1305   :  { %v1665_v40 = vadd.f32 %v1663_v39, %v1655_v38 }
0x1307   :  { %2153 = vtanh.f32 %v1665_v40 }
0x130d   :  { %v2154_v42 = vpop.eup %2153 }
0x130e   :  { %1668 = vrot.lane.b32.xlu0 %v2154_v42, %s2274_s26 }
0x1339   :  { %v1729_v43 = vpop.permute.xlu1 %1728 }
0x133a   :  { %v1731_v44 = vmul.f32 %v1729_v43, %v1712_v55 }
0x133c   :  { %1733 = vrot.lane.b32.xlu2 %v1731_v44, %s2275_s27 }
0x1380   :  { %v1669_v45 = vpop.permute.xlu0 %1668 }
0x1381   :  { %v1671_v41 = vmul.f32 %v1669_v45, %v1652_v31 }
0x1383   :  { %1737 = vrot.lane.b32.xlu0 %v1671_v41, %s2276_s23 }
0x1396   :  { %v1734_v47 = vpop.permute.xlu2 %1733 }
0x13f5   :  { %v1738_v48 = vpop.permute.xlu0 %1737 }
0x13f6   :  { %v1740_v49 = vsel %vm748_vm4, %v1734_v47, %v1738_v48 }
0x13f7   :  { %v1741_v54 = vpack.c.bf16 %v1740_v49, %v1740_v49 }
0x13f9   :  { %1991 = vmatmul.msk.bf16.vlgmr.msrb.gmra.mxu3 %vm484_vm3, %v1741_v54 }
0x147c   :  { %v1754_v19 = vpop.f32.mrf.mxu3 }
0x147d   :  { %v1755_v1 = vadd.f32 %v2779_v7, %v1754_v19 }
0x147f   :  { %2155 = vtanh.f32 %v1755_v1  ;;  %v1992_v63 = vmul.f32 -1.442695, %v1755_v1 }
0x1481   :  { %2157 = vpow2.f32 %v1992_v63 }
0x1484   :  { %v1756_v57 = vpop.f32.mrf.mxu3 }
0x1485   :  { %v2156_v61 = vpop.eup %2155 }
0x1486   :  { %1780 = vrot.lane.b32.xlu1 %v2156_v61, %s2274_s26 }
0x1487   :  { %v2158_v60 = vpop.eup %2157 }
0x1488   :  { %v1761_v2 = vadd.f32 1.0, %v2158_v60 }
0x148a   :  { %2159 = vrcp.f32 %v1761_v2  ;;  %v1773_v9 = vand.u32 2147483648, %v1761_v2  ;;  %vm1767_vm3 = vweird.f32 %v1761_v2  ;;  %v1771_v15 = vand.u32 2147483647, %v1761_v2 }
0x148c   :  { %v1774_v58 = vor.u32 1.1754944e-38, %v1773_v9  ;;  %vm1772_vm11 = vcmp.eq.f32.partialorder %v1771_v15, 8.507059e+37 }
0x1490   :  { %v2160_v5 = vpop.eup %2159 }
0x1491   :  { %v1763_v52 = vmul.f32 %v2160_v5, %v1761_v2  ;;  %vm1768_vm9 = vweird.f32 %v2160_v5 }
0x1492   :  { %vm1769_vm10 = vmor %vm1767_vm3, %vm1768_vm9 }
0x1493   :  { %v1764_v4 = vsub.f32 1.0, %v1763_v52 }
0x1495   :  { %v1765_v3 = vmul.f32 %v2160_v5, %v1764_v4 }
0x1497   :  { %v1766_v8 = vadd.f32 %v2160_v5, %v1765_v3 }
0x1499   :  { %v1770_v7 = vsel %vm1769_vm10, %v2160_v5, %v1766_v8 }
0x149a   :  { %v1775_v11 = vsel %vm1772_vm11, %v1774_v58, %v1770_v7 }
0x149b   :  { %v1778_v14 = vmul.f32 %v1775_v11, %v1665_v40 }
0x14f8   :  { %v1781_v10 = vpop.permute.xlu1 %1780 }
0x14f9   :  { %v1783_v62 = vmul.f32 %v1781_v10, %v1775_v11 }
0x14fb   :  { %1785 = vrot.lane.b32.xlu2 %v1783_v62, %s2274_s26 }
0x1555   :  { %v1786_v13 = vpop.permute.xlu2 %1785 }
0x1556   :  { %v1788_v51 = vadd.f32 %v1786_v13, %v1778_v14 }
0x1558   :  { %2161 = vtanh.f32 %v1788_v51 }
0x155e   :  { %v2162_v6 = vpop.eup %2161 }
0x155f   :  { %1791 = vrot.lane.b32.xlu0 %v2162_v6, %s2274_s26 }
0x15d1   :  { %v1792_v26 = vpop.permute.xlu0 %1791 }
0x15d2   :  { %v1794_v27 = vmul.f32 %v1792_v26, %v1775_v11 }
0x15d4   :  { %v1795_v55 = vpack.c.bf16 %v1794_v27, %v1794_v27 }
0x15d6   :  { %1807 = vrot.lane.b32.xlu1 %v1795_v55, %s2275_s27 }
0x1648   :  { %v1808_v50 = vpop.permute.xlu1 %1807 }
0x1649   :  { %1993 = vmatmul.msk.bf16.vlgmr.msrb.gmra.mxu0 %vm748_vm4, %v1808_v50 }
0x16c6   :  { %v1821_v23 = vpop.f32.mrf.mxu0 }
0x16c7   :  { %v1822_v53 = vadd.f32 %v2034_v0, %v1821_v23 }
0x16c9   :  { %1826 = vst.msk [vmem:[%s2816_s14] sm:$0xff] %vm1825_vm12, %v1822_v53 }
0x16ce   :  { %v1823_v56 = vpop.f32.mrf.mxu0 }
0x16cf   :  { %1831 = vsyncpa [#allocation7], 1 }
0x16d0   :  { %1832 = vsyncpa [#allocation9], 1 }
0x16d1   :  { %1833 = vsyncpa [#allocation12], 1 }

</bundles_post_ra>
